<compile_context>
chip_gen: v6e
topology: v6e:2x2x1
jax: 0.10.0
libtpu: 0.0.40
codegen_flags: <defaults>
</compile_context>

<pallas_src>
import math

import jax
import jax.numpy as jnp
from jax import lax
from jax.experimental import pallas as pl
from jax.experimental.pallas import tpu as pltpu

NR_MIX = 10
LOGIT_OFF = 0          # rows [  0, 10)
MEANS_OFF = 16         # rows [ 16, 46)
SCALES_OFF = 48        # rows [ 48, 78)
COEFFS_OFF = 80        # rows [ 80,110)
P_PAD = 112
LOG_127_5 = math.log(127.5)


def _dlm_kernel(xp_ref, x_ref, gum_ref, lu_ref, w_ref, b_ref, lp_ref, samp_ref):
    # xp_ref  : (Cin, T) bf16  decoder features (child forward() bypasses the
    #                           parent activation, so none is applied here)
    # x_ref   : (3, T)   f32   true image pixels in [0, 1]
    # gum_ref : (10, T)  f32   gumbel noise  (-log(-log u)), precomputed
    # lu_ref  : (3, T)   f32   logistic noise (log u - log(1-u)), precomputed
    # w_ref   : (112, Cin) bf16 re-packed / padded 1x1 conv weight
    # b_ref   : (112, 1) f32   matching bias
    # lp_ref  : (1, T)   f32   per-pixel log-prob (lane-dense)
    # samp_ref: (3, T)   f32   rsamples in [0, 1] (lane-dense, single store)
    T = xp_ref.shape[1]
    M3 = 3 * NR_MIX

    # ---- 1x1 conv (parameter net) on the MXU: (112, Cin) @ (Cin, T) --------
    l = jnp.dot(w_ref[...], xp_ref[...],
                preferred_element_type=jnp.float32) + b_ref[...]      # (112, T)

    xt = x_ref[...] * 2.0 - 1.0                                       # (3, T) in [-1, 1]
    xt0 = xt[0:1, :]
    xt1 = xt[1:2, :]
    xt2 = xt[2:3, :]

    logit_probs = l[LOGIT_OFF:LOGIT_OFF + NR_MIX, :]                  # (10, T)
    means_all = l[MEANS_OFF:MEANS_OFF + M3, :]                        # (30, T)
    log_scales_all = jnp.maximum(l[SCALES_OFF:SCALES_OFF + M3, :], -7.0)
    coeffs_all = jnp.tanh(l[COEFFS_OFF:COEFFS_OFF + M3, :])           # (30, T)

    # replicate xt to (30, T): rows [10c, 10c+10) hold colour channel c
    xt_rep = jnp.concatenate([
        jnp.broadcast_to(xt0, (NR_MIX, T)),
        jnp.broadcast_to(xt1, (NR_MIX, T)),
        jnp.broadcast_to(xt2, (NR_MIX, T)),
    ], axis=0)                                                        # (30, T)

    # autoregressive mean adjustment for all 3 channels at once (only depends
    # on the true x, not on previous channel results -> fully parallel)
    m_adj = jnp.concatenate([
        means_all[0:NR_MIX, :],
        means_all[NR_MIX:2 * NR_MIX, :]
        + coeffs_all[0:NR_MIX, :] * xt0,
        means_all[2 * NR_MIX:3 * NR_MIX, :]
        + coeffs_all[NR_MIX:2 * NR_MIX, :] * xt0
        + coeffs_all[2 * NR_MIX:3 * NR_MIX, :] * xt1,
    ], axis=0)                                                        # (30, T)

    # ---- discretized-logistic log-likelihood: one fused (30, T) pass -------
    centered = xt_rep - m_adj
    inv_stdv = jnp.exp(-log_scales_all)
    plus_in = inv_stdv * (centered + 1.0 / 255.0)
    min_in = inv_stdv * (centered - 1.0 / 255.0)
    mid_in = inv_stdv * centered

    def softplus_and_sigmoid(v):
        # share one exp between softplus and sigmoid:
        #   e = exp(-|v|); softplus(v) = max(v,0) + log(1+e)
        #   sigmoid(v)    = 1/(1+e) if v >= 0 else e/(1+e)
        e = jnp.exp(-jnp.abs(v))
        log1pe = jnp.log(1.0 + e)
        sp = jnp.maximum(v, 0.0) + log1pe
        r = 1.0 / (1.0 + e)
        sig = jnp.where(v >= 0.0, r, e * r)
        return sp, sig

    sp_plus, cdf_plus = softplus_and_sigmoid(plus_in)
    sp_min, cdf_min = softplus_and_sigmoid(min_in)
    log_cdf_plus = plus_in - sp_plus                    # log sigmoid(plus_in)
    log_one_minus_cdf_min = -sp_min                     # log(1 - sigmoid(min_in))
    cdf_delta = cdf_plus - cdf_min

    e_mid = jnp.exp(-jnp.abs(mid_in))
    sp_mid = jnp.maximum(mid_in, 0.0) + jnp.log(1.0 + e_mid)
    log_pdf_mid = mid_in - log_scales_all - 2.0 * sp_mid

    inner_inner = jnp.where(cdf_delta > 1e-5,
                            jnp.log(jnp.maximum(cdf_delta, 1e-12)),
                            log_pdf_mid - LOG_127_5)
    inner = jnp.where(xt_rep > 0.999, log_one_minus_cdf_min, inner_inner)
    log_probs_all = jnp.where(xt_rep < -0.999, log_cdf_plus, inner)   # (30, T)

    # log_softmax over the mixture (sublane) axis, then sum the 3 channels
    lp_max = jnp.max(logit_probs, axis=0, keepdims=True)
    lse = lp_max + jnp.log(jnp.sum(jnp.exp(logit_probs - lp_max),
                                   axis=0, keepdims=True))
    total = (logit_probs - lse
             + log_probs_all[0:NR_MIX, :]
             + log_probs_all[NR_MIX:2 * NR_MIX, :]
             + log_probs_all[2 * NR_MIX:3 * NR_MIX, :])               # (10, T)

    t_max = jnp.max(total, axis=0, keepdims=True)
    lp_ref[...] = t_max + jnp.log(jnp.sum(jnp.exp(total - t_max),
                                          axis=0, keepdims=True))

    # ---- rsample: gumbel-argmax component selection (first-argmax ties) ----
    g = logit_probs + gum_ref[...]                                    # (10, T)
    gmax = jnp.max(g, axis=0, keepdims=True)
    mix_ids = lax.broadcasted_iota(jnp.int32, (NR_MIX, T), 0)
    cand = jnp.where(g >= gmax, mix_ids, NR_MIX)
    amin = jnp.min(cand, axis=0, keepdims=True)
    sel = (mix_ids == amin).astype(jnp.float32)                       # (10, T) one-hot
    sel_rep = jnp.concatenate([sel, sel, sel], axis=0)                # (30, T)

    mu_masked = means_all * sel_rep
    ls_masked = log_scales_all * sel_rep
    co_masked = coeffs_all * sel_rep
    mu_sel = [jnp.sum(mu_masked[c * NR_MIX:(c + 1) * NR_MIX, :],
                      axis=0, keepdims=True) for c in range(3)]       # 3 x (1, T)
    ls_sel = [jnp.sum(ls_masked[c * NR_MIX:(c + 1) * NR_MIX, :],
                      axis=0, keepdims=True) for c in range(3)]
    co_sel = [jnp.sum(co_masked[c * NR_MIX:(c + 1) * NR_MIX, :],
                      axis=0, keepdims=True) for c in range(3)]

    logit_u = lu_ref[...]                                             # (3, T)
    xraw = [mu_sel[c] + jnp.exp(ls_sel[c]) * logit_u[c:c + 1, :] for c in range(3)]
    s0 = jnp.clip(xraw[0], -1.0, 1.0)
    s1 = jnp.clip(xraw[1] + co_sel[0] * s0, -1.0, 1.0)
    s2 = jnp.clip(xraw[2] + co_sel[1] * s0 + co_sel[2] * s1, -1.0, 1.0)
    samp = jnp.concatenate([s0, s1, s2], axis=0)                      # (3, T)
    samp_ref[...] = jnp.clip((samp + 1.0) * 0.5, 0.0, 1.0)            # one store


def _pack_params(weight, bias, cin):
    """Re-pack the 100 conv output features into the fused 112-row layout.

    PyTorch layout of the 1x1 conv output channels (from the reference code):
      [0:10]                  mixture logits
      [10+30c+ 0 : 10+30c+10] means      of colour channel c
      [10+30c+10 : 10+30c+20] log_scales of colour channel c
      [10+30c+20 : 10+30c+30] coeffs     of colour channel c
    Packed rows: logits@[0,16), means@[16,48), log_scales@[48,80), coeffs@[80,112).
    """
    outf = weight.shape[0]
    w2d = weight.reshape(outf, cin).astype(jnp.float32)
    b1d = bias.astype(jnp.float32)

    def gather(slices, pad_to):
        w = jnp.concatenate([w2d[s] for s in slices], axis=0)
        b = jnp.concatenate([b1d[s] for s in slices], axis=0)
        pad = pad_to - w.shape[0]
        w = jnp.concatenate([w, jnp.zeros((pad, cin), w.dtype)], axis=0)
        b = jnp.concatenate([b, jnp.zeros((pad,), b.dtype)], axis=0)
        return w, b

    logit_sl = [slice(0, NR_MIX)]
    mean_sl = [slice(NR_MIX + 30 * c, NR_MIX + 30 * c + NR_MIX) for c in range(3)]
    scale_sl = [slice(NR_MIX + 30 * c + NR_MIX, NR_MIX + 30 * c + 2 * NR_MIX)
                for c in range(3)]
    coef_sl = [slice(NR_MIX + 30 * c + 2 * NR_MIX, NR_MIX + 30 * c + 3 * NR_MIX)
               for c in range(3)]

    parts = [gather(logit_sl, 16), gather(mean_sl, 32),
             gather(scale_sl, 32), gather(coef_sl, 32)]
    w_pad = jnp.concatenate([p[0] for p in parts], axis=0)
    b_pad = jnp.concatenate([p[1] for p in parts], axis=0)
    assert w_pad.shape[0] == P_PAD
    return w_pad.astype(jnp.bfloat16), b_pad.reshape(P_PAD, 1).astype(jnp.float32)


def _pick_tile(npix, tile_cap):
    """Largest 128-multiple tile dividing npix, <= tile_cap; prefer >= 2 grid
    steps so v7x's two TensorCores both get work."""
    best = 128
    for t in range(128, min(tile_cap, npix) + 1, 128):
        if npix % t == 0:
            best = t
    if best == npix and npix >= 256:
        half_best = 128
        for t in range(128, npix // 2 + 1, 128):
            if npix % t == 0:
                half_best = t
        best = half_best
    return best


def dlm_conv2d_forward(x_p, x, weight, bias, key, tile=2048):
    """Forward pass of DiscretizedLogisticMixLikelihoodConv2d.

    Args:
      x_p:    (B, Cin, H, W) decoder features (NCHW, like PyTorch).
      x:      (B, 3, H, W)   original image in [0, 1] (NCHW).
      weight: (100, Cin, 1, 1) 1x1 conv weight (already weight-normalized).
      bias:   (100,)           conv bias.
      key:    PRNG key for the sampling noise (jax.random, reproducible).
      tile:   max pixels per grid step (cap; actual tile auto-selected).
    Returns:
      likelihood: (B,) per-image log-likelihood.
      samples:    (B, 3, H, W) rsamples, clamped to [0, 1].
    """
    B, Cin, H, W = x_p.shape
    npix = B * H * W
    assert npix % 128 == 0, "B*H*W must be a multiple of 128"

    # pixels-on-lanes layout: (channels, B*H*W); features as bf16 (halves the
    # dominant HBM read stream; f32 accumulation in the kernel).
    xp_t = jnp.transpose(x_p, (1, 0, 2, 3)).reshape(Cin, npix).astype(jnp.bfloat16)
    x_t = jnp.transpose(x, (1, 0, 2, 3)).reshape(3, npix).astype(jnp.float32)
    w_pad, b_pad = _pack_params(weight, bias, Cin)

    # Sampling noise (uniform in [1e-5, 1-1e-5]) generated with jax.random in
    # the wrapper; the gumbel / logistic transforms are precomputed here so the
    # EUP-bound kernel does not pay for them.
    k1, k2 = jax.random.split(key)
    u_g = jax.random.uniform(k1, (NR_MIX, npix), jnp.float32, 1e-5, 1.0 - 1e-5)
    u_l = jax.random.uniform(k2, (3, npix), jnp.float32, 1e-5, 1.0 - 1e-5)
    gumbel = -jnp.log(-jnp.log(u_g))                 # (10, npix)
    logit_u = jnp.log(u_l) - jnp.log(1.0 - u_l)      # (3, npix)

    t = _pick_tile(npix, tile)
    grid = npix // t

    lp, samp = pl.pallas_call(
        _dlm_kernel,
        out_shape=(
            jax.ShapeDtypeStruct((1, npix), jnp.float32),
            jax.ShapeDtypeStruct((3, npix), jnp.float32),
        ),
        grid_spec=pltpu.PrefetchScalarGridSpec(
            num_scalar_prefetch=0,
            grid=(grid,),
            in_specs=[
                pl.BlockSpec((Cin, t), lambda i: (0, i)),
                pl.BlockSpec((3, t), lambda i: (0, i)),
                pl.BlockSpec((NR_MIX, t), lambda i: (0, i)),
                pl.BlockSpec((3, t), lambda i: (0, i)),
                pl.BlockSpec((P_PAD, Cin), lambda i: (0, 0)),
                pl.BlockSpec((P_PAD, 1), lambda i: (0, 0)),
            ],
            out_specs=(
                pl.BlockSpec((1, t), lambda i: (0, i)),
                pl.BlockSpec((3, t), lambda i: (0, i)),
            ),
        ),
        compiler_params=pltpu.CompilerParams(
            dimension_semantics=("parallel",),
            vmem_limit_bytes=32 * 1024 * 1024,
        ),
    )(xp_t, x_t, gumbel, logit_u, w_pad, b_pad)

    likelihood = lp.reshape(B, H * W).sum(axis=-1)             # sum over H, W
    samples = samp.reshape(3, B, H, W).transpose(1, 0, 2, 3)   # back to NCHW
    return likelihood, samples


if __name__ == "__main__":
    key = jax.random.PRNGKey(0)
    kx, kp, kw, kb, kn = jax.random.split(key, 5)

    B, Cin, H, W = 2, 4, 16, 16
    out_channels = 3
    out_features = (out_channels * 3 + 1) * NR_MIX            # 100

    # decoder features and original image data (uint8/255 style, in [0, 1])
    x_p = jax.random.normal(kp, (B, Cin, H, W), jnp.float32)
    x = jax.random.uniform(kx, (B, 3, H, W), jnp.float32)
    x = jnp.round(x * 255.0) / 255.0

    # deterministic parameter init mimicking a weight-normalized 1x1 conv (g=1)
    v = 0.05 * jax.random.normal(kw, (out_features, Cin, 1, 1), jnp.float32)
    vnorm = jnp.sqrt(jnp.sum(v * v, axis=(1, 2, 3), keepdims=True))
    weight = v / vnorm
    bias = 0.01 * jax.random.normal(kb, (out_features,), jnp.float32)

    fwd = jax.jit(dlm_conv2d_forward, static_argnames=("tile",))
    likelihood, samples = fwd(x_p, x, weight, bias, kn)
    jax.block_until_ready((likelihood, samples))

    assert likelihood.shape == (B,)
    assert samples.shape == (B, 3, H, W)
    assert bool(jnp.all(jnp.isfinite(likelihood)))
    assert bool(jnp.all(jnp.isfinite(samples)))
    assert bool(jnp.all((samples >= 0.0) & (samples <= 1.0)))
    print("KERNEL_OK")
</pallas_src>

<mosaic_0001>
module attributes {stable_mosaic.version = 11 : i64} {
  func.func @_dlm_kernel(%arg0: i32, %arg1: memref<4x256xbf16, #tpu.memory_space<vmem>>, %arg2: memref<3x256xf32, #tpu.memory_space<vmem>>, %arg3: memref<10x256xf32, #tpu.memory_space<vmem>>, %arg4: memref<3x256xf32, #tpu.memory_space<vmem>>, %arg5: memref<112x4xbf16, #tpu.memory_space<vmem>>, %arg6: memref<112x1xf32, #tpu.memory_space<vmem>>, %arg7: memref<1x256xf32, #tpu.memory_space<vmem>>, %arg8: memref<3x256xf32, #tpu.memory_space<vmem>>) attributes {dimension_semantics = [#tpu.dimension_semantics<parallel>], iteration_bounds = array<i64: 2>, scalar_prefetch = 0 : i64, scratch_operands = 0 : i64, tpu.core_type = #tpu.core_type<tc>, window_params = [{transform_indices = @transform_0, window_bounds = array<i64: 4, 256>}, {transform_indices = @transform_1, window_bounds = array<i64: 3, 256>}, {transform_indices = @transform_2, window_bounds = array<i64: 10, 256>}, {transform_indices = @transform_3, window_bounds = array<i64: 3, 256>}, {pipeline_mode = #tpu.pipeline_mode<synchronous>, transform_indices = @transform_4, window_bounds = array<i64: 112, 4>}, {pipeline_mode = #tpu.pipeline_mode<synchronous>, transform_indices = @transform_5, window_bounds = array<i64: 112, 1>}, {transform_indices = @transform_6, window_bounds = array<i64: 1, 256>}, {transform_indices = @transform_7, window_bounds = array<i64: 3, 256>}]} {
    %c0 = arith.constant 0 : index
    %c0_0 = arith.constant 0 : index
    %0 = vector.load %arg5[%c0, %c0_0] : memref<112x4xbf16, #tpu.memory_space<vmem>>, vector<112x4xbf16>
    %c0_1 = arith.constant 0 : index
    %c0_2 = arith.constant 0 : index
    %1 = vector.load %arg1[%c0_1, %c0_2] : memref<4x256xbf16, #tpu.memory_space<vmem>>, vector<4x256xbf16>
    %cst = arith.constant dense<0.000000e+00> : vector<112x256xf32>
    %2 = tpu.matmul %0, %1, %cst {dimension_numbers = #tpu.dot_dimension_numbers<[1], [0], [0], [1], [0, 0, 1, 1], [], []>} : vector<112x4xbf16>, vector<4x256xbf16>, vector<112x256xf32> -> vector<112x256xf32>
    %c0_3 = arith.constant 0 : index
    %c0_4 = arith.constant 0 : index
    %3 = vector.load %arg6[%c0_3, %c0_4] : memref<112x1xf32, #tpu.memory_space<vmem>>, vector<112x1xf32>
    %4 = vector.broadcast %3 : vector<112x1xf32> to vector<112x256xf32>
    %5 = arith.addf %2, %4 : vector<112x256xf32>
    %c0_5 = arith.constant 0 : index
    %c0_6 = arith.constant 0 : index
    %6 = vector.load %arg2[%c0_5, %c0_6] : memref<3x256xf32, #tpu.memory_space<vmem>>, vector<3x256xf32>
    %cst_7 = arith.constant 2.000000e+00 : f32
    %7 = vector.broadcast %cst_7 : f32 to vector<3x256xf32>
    %8 = arith.mulf %6, %7 : vector<3x256xf32>
    %cst_8 = arith.constant 1.000000e+00 : f32
    %9 = vector.broadcast %cst_8 : f32 to vector<3x256xf32>
    %10 = arith.subf %8, %9 : vector<3x256xf32>
    %11 = vector.extract_strided_slice %10 {offsets = [0, 0], sizes = [1, 256], strides = [1, 1]} : vector<3x256xf32> to vector<1x256xf32>
    %12 = vector.extract_strided_slice %10 {offsets = [1, 0], sizes = [1, 256], strides = [1, 1]} : vector<3x256xf32> to vector<1x256xf32>
    %13 = vector.extract_strided_slice %10 {offsets = [2, 0], sizes = [1, 256], strides = [1, 1]} : vector<3x256xf32> to vector<1x256xf32>
    %14 = vector.extract_strided_slice %5 {offsets = [0, 0], sizes = [10, 256], strides = [1, 1]} : vector<112x256xf32> to vector<10x256xf32>
    %15 = vector.extract_strided_slice %5 {offsets = [16, 0], sizes = [30, 256], strides = [1, 1]} : vector<112x256xf32> to vector<30x256xf32>
    %16 = vector.extract_strided_slice %5 {offsets = [48, 0], sizes = [30, 256], strides = [1, 1]} : vector<112x256xf32> to vector<30x256xf32>
    %cst_9 = arith.constant -7.000000e+00 : f32
    %17 = vector.broadcast %cst_9 : f32 to vector<30x256xf32>
    %18 = arith.maximumf %16, %17 : vector<30x256xf32>
    %19 = vector.extract_strided_slice %5 {offsets = [80, 0], sizes = [30, 256], strides = [1, 1]} : vector<112x256xf32> to vector<30x256xf32>
    %20 = math.tanh %19 : vector<30x256xf32>
    %21 = vector.shape_cast %11 : vector<1x256xf32> to vector<1x256xf32>
    %22 = vector.broadcast %21 : vector<1x256xf32> to vector<10x256xf32>
    %23 = vector.shape_cast %12 : vector<1x256xf32> to vector<1x256xf32>
    %24 = vector.broadcast %23 : vector<1x256xf32> to vector<10x256xf32>
    %25 = vector.shape_cast %13 : vector<1x256xf32> to vector<1x256xf32>
    %26 = vector.broadcast %25 : vector<1x256xf32> to vector<10x256xf32>
    %27 = tpu.concatenate %22, %24, %26 in 0 : vector<10x256xf32>, vector<10x256xf32>, vector<10x256xf32> -> vector<30x256xf32>
    %28 = vector.extract_strided_slice %15 {offsets = [0, 0], sizes = [10, 256], strides = [1, 1]} : vector<30x256xf32> to vector<10x256xf32>
    %29 = vector.extract_strided_slice %15 {offsets = [10, 0], sizes = [10, 256], strides = [1, 1]} : vector<30x256xf32> to vector<10x256xf32>
    %30 = vector.extract_strided_slice %20 {offsets = [0, 0], sizes = [10, 256], strides = [1, 1]} : vector<30x256xf32> to vector<10x256xf32>
    %31 = vector.broadcast %11 : vector<1x256xf32> to vector<10x256xf32>
    %32 = arith.mulf %30, %31 : vector<10x256xf32>
    %33 = arith.addf %29, %32 : vector<10x256xf32>
    %34 = vector.extract_strided_slice %15 {offsets = [20, 0], sizes = [10, 256], strides = [1, 1]} : vector<30x256xf32> to vector<10x256xf32>
    %35 = vector.extract_strided_slice %20 {offsets = [10, 0], sizes = [10, 256], strides = [1, 1]} : vector<30x256xf32> to vector<10x256xf32>
    %36 = vector.broadcast %11 : vector<1x256xf32> to vector<10x256xf32>
    %37 = arith.mulf %35, %36 : vector<10x256xf32>
    %38 = arith.addf %34, %37 : vector<10x256xf32>
    %39 = vector.extract_strided_slice %20 {offsets = [20, 0], sizes = [10, 256], strides = [1, 1]} : vector<30x256xf32> to vector<10x256xf32>
    %40 = vector.broadcast %12 : vector<1x256xf32> to vector<10x256xf32>
    %41 = arith.mulf %39, %40 : vector<10x256xf32>
    %42 = arith.addf %38, %41 : vector<10x256xf32>
    %43 = tpu.concatenate %28, %33, %42 in 0 : vector<10x256xf32>, vector<10x256xf32>, vector<10x256xf32> -> vector<30x256xf32>
    %44 = arith.subf %27, %43 : vector<30x256xf32>
    %cst_10 = arith.constant 0.000000e+00 : f32
    %45 = vector.broadcast %cst_10 : f32 to vector<30x256xf32>
    %46 = arith.subf %45, %18 : vector<30x256xf32>
    %47 = math.exp %46 : vector<30x256xf32>
    %cst_11 = arith.constant 0.00392156886 : f32
    %48 = vector.broadcast %cst_11 : f32 to vector<30x256xf32>
    %49 = arith.addf %44, %48 : vector<30x256xf32>
    %50 = arith.mulf %47, %49 : vector<30x256xf32>
    %cst_12 = arith.constant 0.00392156886 : f32
    %51 = vector.broadcast %cst_12 : f32 to vector<30x256xf32>
    %52 = arith.subf %44, %51 : vector<30x256xf32>
    %53 = arith.mulf %47, %52 : vector<30x256xf32>
    %54 = arith.mulf %47, %44 : vector<30x256xf32>
    %55 = math.absf %50 : vector<30x256xf32>
    %cst_13 = arith.constant 0.000000e+00 : f32
    %56 = vector.broadcast %cst_13 : f32 to vector<30x256xf32>
    %57 = arith.subf %56, %55 : vector<30x256xf32>
    %58 = math.exp %57 : vector<30x256xf32>
    %cst_14 = arith.constant 1.000000e+00 : f32
    %59 = vector.broadcast %cst_14 : f32 to vector<30x256xf32>
    %60 = arith.addf %59, %58 : vector<30x256xf32>
    %61 = math.log %60 : vector<30x256xf32>
    %cst_15 = arith.constant 0.000000e+00 : f32
    %62 = vector.broadcast %cst_15 : f32 to vector<30x256xf32>
    %63 = arith.maximumf %50, %62 : vector<30x256xf32>
    %64 = arith.addf %63, %61 : vector<30x256xf32>
    %cst_16 = arith.constant 1.000000e+00 : f32
    %65 = vector.broadcast %cst_16 : f32 to vector<30x256xf32>
    %66 = arith.addf %65, %58 : vector<30x256xf32>
    %cst_17 = arith.constant 1.000000e+00 : f32
    %67 = vector.broadcast %cst_17 : f32 to vector<30x256xf32>
    %68 = arith.divf %67, %66 : vector<30x256xf32>
    %cst_18 = arith.constant 0.000000e+00 : f32
    %69 = vector.broadcast %cst_18 : f32 to vector<30x256xf32>
    %70 = arith.cmpf oge, %50, %69 : vector<30x256xf32>
    %71 = arith.mulf %58, %68 : vector<30x256xf32>
    %72 = arith.select %70, %68, %71 : vector<30x256xi1>, vector<30x256xf32>
    %73 = math.absf %53 : vector<30x256xf32>
    %cst_19 = arith.constant 0.000000e+00 : f32
    %74 = vector.broadcast %cst_19 : f32 to vector<30x256xf32>
    %75 = arith.subf %74, %73 : vector<30x256xf32>
    %76 = math.exp %75 : vector<30x256xf32>
    %cst_20 = arith.constant 1.000000e+00 : f32
    %77 = vector.broadcast %cst_20 : f32 to vector<30x256xf32>
    %78 = arith.addf %77, %76 : vector<30x256xf32>
    %79 = math.log %78 : vector<30x256xf32>
    %cst_21 = arith.constant 0.000000e+00 : f32
    %80 = vector.broadcast %cst_21 : f32 to vector<30x256xf32>
    %81 = arith.maximumf %53, %80 : vector<30x256xf32>
    %82 = arith.addf %81, %79 : vector<30x256xf32>
    %cst_22 = arith.constant 1.000000e+00 : f32
    %83 = vector.broadcast %cst_22 : f32 to vector<30x256xf32>
    %84 = arith.addf %83, %76 : vector<30x256xf32>
    %cst_23 = arith.constant 1.000000e+00 : f32
    %85 = vector.broadcast %cst_23 : f32 to vector<30x256xf32>
    %86 = arith.divf %85, %84 : vector<30x256xf32>
    %cst_24 = arith.constant 0.000000e+00 : f32
    %87 = vector.broadcast %cst_24 : f32 to vector<30x256xf32>
    %88 = arith.cmpf oge, %53, %87 : vector<30x256xf32>
    %89 = arith.mulf %76, %86 : vector<30x256xf32>
    %90 = arith.select %88, %86, %89 : vector<30x256xi1>, vector<30x256xf32>
    %91 = arith.subf %50, %64 : vector<30x256xf32>
    %cst_25 = arith.constant 0.000000e+00 : f32
    %92 = vector.broadcast %cst_25 : f32 to vector<30x256xf32>
    %93 = arith.subf %92, %82 : vector<30x256xf32>
    %94 = arith.subf %72, %90 : vector<30x256xf32>
    %95 = math.absf %54 : vector<30x256xf32>
    %cst_26 = arith.constant 0.000000e+00 : f32
    %96 = vector.broadcast %cst_26 : f32 to vector<30x256xf32>
    %97 = arith.subf %96, %95 : vector<30x256xf32>
    %98 = math.exp %97 : vector<30x256xf32>
    %cst_27 = arith.constant 0.000000e+00 : f32
    %99 = vector.broadcast %cst_27 : f32 to vector<30x256xf32>
    %100 = arith.maximumf %54, %99 : vector<30x256xf32>
    %cst_28 = arith.constant 1.000000e+00 : f32
    %101 = vector.broadcast %cst_28 : f32 to vector<30x256xf32>
    %102 = arith.addf %101, %98 : vector<30x256xf32>
    %103 = math.log %102 : vector<30x256xf32>
    %104 = arith.addf %100, %103 : vector<30x256xf32>
    %105 = arith.subf %54, %18 : vector<30x256xf32>
    %cst_29 = arith.constant 2.000000e+00 : f32
    %106 = vector.broadcast %cst_29 : f32 to vector<30x256xf32>
    %107 = arith.mulf %106, %104 : vector<30x256xf32>
    %108 = arith.subf %105, %107 : vector<30x256xf32>
    %cst_30 = arith.constant 9.99999974E-6 : f32
    %109 = vector.broadcast %cst_30 : f32 to vector<30x256xf32>
    %110 = arith.cmpf ogt, %94, %109 : vector<30x256xf32>
    %cst_31 = arith.constant 9.99999996E-13 : f32
    %111 = vector.broadcast %cst_31 : f32 to vector<30x256xf32>
    %112 = arith.maximumf %94, %111 : vector<30x256xf32>
    %113 = math.log %112 : vector<30x256xf32>
    %cst_32 = arith.constant 4.8481164 : f32
    %114 = vector.broadcast %cst_32 : f32 to vector<30x256xf32>
    %115 = arith.subf %108, %114 : vector<30x256xf32>
    %116 = arith.select %110, %113, %115 : vector<30x256xi1>, vector<30x256xf32>
    %cst_33 = arith.constant 9.990000e-01 : f32
    %117 = vector.broadcast %cst_33 : f32 to vector<30x256xf32>
    %118 = arith.cmpf ogt, %27, %117 : vector<30x256xf32>
    %119 = arith.select %118, %93, %116 : vector<30x256xi1>, vector<30x256xf32>
    %cst_34 = arith.constant -9.990000e-01 : f32
    %120 = vector.broadcast %cst_34 : f32 to vector<30x256xf32>
    %121 = arith.cmpf olt, %27, %120 : vector<30x256xf32>
    %122 = arith.select %121, %91, %119 : vector<30x256xi1>, vector<30x256xf32>
    %cst_35 = arith.constant dense<0xFF800000> : vector<256xf32>
    %123 = vector.multi_reduction <maximumf>, %14, %cst_35 [0] : vector<10x256xf32> to vector<256xf32>
    %124 = vector.shape_cast %123 : vector<256xf32> to vector<1x256xf32>
    %125 = vector.broadcast %124 : vector<1x256xf32> to vector<10x256xf32>
    %126 = arith.subf %14, %125 : vector<10x256xf32>
    %127 = math.exp %126 : vector<10x256xf32>
    %cst_36 = arith.constant dense<0.000000e+00> : vector<256xf32>
    %128 = vector.multi_reduction <add>, %127, %cst_36 [0] : vector<10x256xf32> to vector<256xf32>
    %129 = vector.shape_cast %128 : vector<256xf32> to vector<1x256xf32>
    %130 = math.log %129 : vector<1x256xf32>
    %131 = arith.addf %124, %130 : vector<1x256xf32>
    %132 = vector.broadcast %131 : vector<1x256xf32> to vector<10x256xf32>
    %133 = arith.subf %14, %132 : vector<10x256xf32>
    %134 = vector.extract_strided_slice %122 {offsets = [0, 0], sizes = [10, 256], strides = [1, 1]} : vector<30x256xf32> to vector<10x256xf32>
    %135 = arith.addf %133, %134 : vector<10x256xf32>
    %136 = vector.extract_strided_slice %122 {offsets = [10, 0], sizes = [10, 256], strides = [1, 1]} : vector<30x256xf32> to vector<10x256xf32>
    %137 = arith.addf %135, %136 : vector<10x256xf32>
    %138 = vector.extract_strided_slice %122 {offsets = [20, 0], sizes = [10, 256], strides = [1, 1]} : vector<30x256xf32> to vector<10x256xf32>
    %139 = arith.addf %137, %138 : vector<10x256xf32>
    %cst_37 = arith.constant dense<0xFF800000> : vector<256xf32>
    %140 = vector.multi_reduction <maximumf>, %139, %cst_37 [0] : vector<10x256xf32> to vector<256xf32>
    %141 = vector.shape_cast %140 : vector<256xf32> to vector<1x256xf32>
    %142 = vector.broadcast %141 : vector<1x256xf32> to vector<10x256xf32>
    %143 = arith.subf %139, %142 : vector<10x256xf32>
    %144 = math.exp %143 : vector<10x256xf32>
    %cst_38 = arith.constant dense<0.000000e+00> : vector<256xf32>
    %145 = vector.multi_reduction <add>, %144, %cst_38 [0] : vector<10x256xf32> to vector<256xf32>
    %146 = vector.shape_cast %145 : vector<256xf32> to vector<1x256xf32>
    %147 = math.log %146 : vector<1x256xf32>
    %148 = arith.addf %141, %147 : vector<1x256xf32>
    %c0_39 = arith.constant 0 : index
    %c0_40 = arith.constant 0 : index
    %149 = vector.load %arg7[%c0_39, %c0_40] : memref<1x256xf32, #tpu.memory_space<vmem>>, vector<1x256xf32>
    tpu.vector_store %arg7[%c0_39, %c0_40], %148 {strides = array<i32>} : memref<1x256xf32, #tpu.memory_space<vmem>>, vector<1x256xf32>,
    %c0_41 = arith.constant 0 : index
    %c0_42 = arith.constant 0 : index
    %150 = vector.load %arg3[%c0_41, %c0_42] : memref<10x256xf32, #tpu.memory_space<vmem>>, vector<10x256xf32>
    %151 = arith.addf %14, %150 : vector<10x256xf32>
    %cst_43 = arith.constant dense<0xFF800000> : vector<256xf32>
    %152 = vector.multi_reduction <maximumf>, %151, %cst_43 [0] : vector<10x256xf32> to vector<256xf32>
    %153 = vector.shape_cast %152 : vector<256xf32> to vector<1x256xf32>
    %154 = tpu.iota {dimensions = array<i32: 0>} : vector<10x256xi32>
    %155 = vector.broadcast %153 : vector<1x256xf32> to vector<10x256xf32>
    %156 = arith.cmpf oge, %151, %155 : vector<10x256xf32>
    %c10_i32 = arith.constant 10 : i32
    %157 = vector.broadcast %c10_i32 : i32 to vector<10x256xi32>
    %158 = arith.select %156, %154, %157 : vector<10x256xi1>, vector<10x256xi32>
    %cst_44 = arith.constant dense<2147483647> : vector<256xi32>
    %159 = vector.multi_reduction <minsi>, %158, %cst_44 [0] : vector<10x256xi32> to vector<256xi32>
    %160 = vector.shape_cast %159 : vector<256xi32> to vector<1x256xi32>
    %161 = vector.broadcast %160 : vector<1x256xi32> to vector<10x256xi32>
    %162 = arith.cmpi eq, %154, %161 : vector<10x256xi32>
    %163 = arith.extui %162 : vector<10x256xi1> to vector<10x256xi32>
    %164 = arith.sitofp %163 : vector<10x256xi32> to vector<10x256xf32>
    %165 = tpu.concatenate %164, %164, %164 in 0 : vector<10x256xf32>, vector<10x256xf32>, vector<10x256xf32> -> vector<30x256xf32>
    %166 = arith.mulf %15, %165 : vector<30x256xf32>
    %167 = arith.mulf %18, %165 : vector<30x256xf32>
    %168 = arith.mulf %20, %165 : vector<30x256xf32>
    %169 = vector.extract_strided_slice %166 {offsets = [0, 0], sizes = [10, 256], strides = [1, 1]} : vector<30x256xf32> to vector<10x256xf32>
    %cst_45 = arith.constant dense<0.000000e+00> : vector<256xf32>
    %170 = vector.multi_reduction <add>, %169, %cst_45 [0] : vector<10x256xf32> to vector<256xf32>
    %171 = vector.shape_cast %170 : vector<256xf32> to vector<1x256xf32>
    %172 = vector.extract_strided_slice %166 {offsets = [10, 0], sizes = [10, 256], strides = [1, 1]} : vector<30x256xf32> to vector<10x256xf32>
    %cst_46 = arith.constant dense<0.000000e+00> : vector<256xf32>
    %173 = vector.multi_reduction <add>, %172, %cst_46 [0] : vector<10x256xf32> to vector<256xf32>
    %174 = vector.shape_cast %173 : vector<256xf32> to vector<1x256xf32>
    %175 = vector.extract_strided_slice %166 {offsets = [20, 0], sizes = [10, 256], strides = [1, 1]} : vector<30x256xf32> to vector<10x256xf32>
    %cst_47 = arith.constant dense<0.000000e+00> : vector<256xf32>
    %176 = vector.multi_reduction <add>, %175, %cst_47 [0] : vector<10x256xf32> to vector<256xf32>
    %177 = vector.shape_cast %176 : vector<256xf32> to vector<1x256xf32>
    %178 = vector.extract_strided_slice %167 {offsets = [0, 0], sizes = [10, 256], strides = [1, 1]} : vector<30x256xf32> to vector<10x256xf32>
    %cst_48 = arith.constant dense<0.000000e+00> : vector<256xf32>
    %179 = vector.multi_reduction <add>, %178, %cst_48 [0] : vector<10x256xf32> to vector<256xf32>
    %180 = vector.shape_cast %179 : vector<256xf32> to vector<1x256xf32>
    %181 = vector.extract_strided_slice %167 {offsets = [10, 0], sizes = [10, 256], strides = [1, 1]} : vector<30x256xf32> to vector<10x256xf32>
    %cst_49 = arith.constant dense<0.000000e+00> : vector<256xf32>
    %182 = vector.multi_reduction <add>, %181, %cst_49 [0] : vector<10x256xf32> to vector<256xf32>
    %183 = vector.shape_cast %182 : vector<256xf32> to vector<1x256xf32>
    %184 = vector.extract_strided_slice %167 {offsets = [20, 0], sizes = [10, 256], strides = [1, 1]} : vector<30x256xf32> to vector<10x256xf32>
    %cst_50 = arith.constant dense<0.000000e+00> : vector<256xf32>
    %185 = vector.multi_reduction <add>, %184, %cst_50 [0] : vector<10x256xf32> to vector<256xf32>
    %186 = vector.shape_cast %185 : vector<256xf32> to vector<1x256xf32>
    %187 = vector.extract_strided_slice %168 {offsets = [0, 0], sizes = [10, 256], strides = [1, 1]} : vector<30x256xf32> to vector<10x256xf32>
    %cst_51 = arith.constant dense<0.000000e+00> : vector<256xf32>
    %188 = vector.multi_reduction <add>, %187, %cst_51 [0] : vector<10x256xf32> to vector<256xf32>
    %189 = vector.shape_cast %188 : vector<256xf32> to vector<1x256xf32>
    %190 = vector.extract_strided_slice %168 {offsets = [10, 0], sizes = [10, 256], strides = [1, 1]} : vector<30x256xf32> to vector<10x256xf32>
    %cst_52 = arith.constant dense<0.000000e+00> : vector<256xf32>
    %191 = vector.multi_reduction <add>, %190, %cst_52 [0] : vector<10x256xf32> to vector<256xf32>
    %192 = vector.shape_cast %191 : vector<256xf32> to vector<1x256xf32>
    %193 = vector.extract_strided_slice %168 {offsets = [20, 0], sizes = [10, 256], strides = [1, 1]} : vector<30x256xf32> to vector<10x256xf32>
    %cst_53 = arith.constant dense<0.000000e+00> : vector<256xf32>
    %194 = vector.multi_reduction <add>, %193, %cst_53 [0] : vector<10x256xf32> to vector<256xf32>
    %195 = vector.shape_cast %194 : vector<256xf32> to vector<1x256xf32>
    %c0_54 = arith.constant 0 : index
    %c0_55 = arith.constant 0 : index
    %196 = vector.load %arg4[%c0_54, %c0_55] : memref<3x256xf32, #tpu.memory_space<vmem>>, vector<3x256xf32>
    %197 = math.exp %180 : vector<1x256xf32>
    %198 = vector.extract_strided_slice %196 {offsets = [0, 0], sizes = [1, 256], strides = [1, 1]} : vector<3x256xf32> to vector<1x256xf32>
    %199 = arith.mulf %197, %198 : vector<1x256xf32>
    %200 = arith.addf %171, %199 : vector<1x256xf32>
    %201 = math.exp %183 : vector<1x256xf32>
    %202 = vector.extract_strided_slice %196 {offsets = [1, 0], sizes = [1, 256], strides = [1, 1]} : vector<3x256xf32> to vector<1x256xf32>
    %203 = arith.mulf %201, %202 : vector<1x256xf32>
    %204 = arith.addf %174, %203 : vector<1x256xf32>
    %205 = math.exp %186 : vector<1x256xf32>
    %206 = vector.extract_strided_slice %196 {offsets = [2, 0], sizes = [1, 256], strides = [1, 1]} : vector<3x256xf32> to vector<1x256xf32>
    %207 = arith.mulf %205, %206 : vector<1x256xf32>
    %208 = arith.addf %177, %207 : vector<1x256xf32>
    %cst_56 = arith.constant -1.000000e+00 : f32
    %cst_57 = arith.constant 1.000000e+00 : f32
    %209 = vector.broadcast %cst_56 : f32 to vector<1x256xf32>
    %210 = arith.maximumf %209, %200 : vector<1x256xf32>
    %211 = vector.broadcast %cst_57 : f32 to vector<1x256xf32>
    %212 = arith.minimumf %211, %210 : vector<1x256xf32>
    %213 = arith.mulf %189, %212 : vector<1x256xf32>
    %214 = arith.addf %204, %213 : vector<1x256xf32>
    %cst_58 = arith.constant -1.000000e+00 : f32
    %cst_59 = arith.constant 1.000000e+00 : f32
    %215 = vector.broadcast %cst_58 : f32 to vector<1x256xf32>
    %216 = arith.maximumf %215, %214 : vector<1x256xf32>
    %217 = vector.broadcast %cst_59 : f32 to vector<1x256xf32>
    %218 = arith.minimumf %217, %216 : vector<1x256xf32>
    %219 = arith.mulf %192, %212 : vector<1x256xf32>
    %220 = arith.addf %208, %219 : vector<1x256xf32>
    %221 = arith.mulf %195, %218 : vector<1x256xf32>
    %222 = arith.addf %220, %221 : vector<1x256xf32>
    %cst_60 = arith.constant -1.000000e+00 : f32
    %cst_61 = arith.constant 1.000000e+00 : f32
    %223 = vector.broadcast %cst_60 : f32 to vector<1x256xf32>
    %224 = arith.maximumf %223, %222 : vector<1x256xf32>
    %225 = vector.broadcast %cst_61 : f32 to vector<1x256xf32>
    %226 = arith.minimumf %225, %224 : vector<1x256xf32>
    %227 = tpu.concatenate %212, %218, %226 in 0 : vector<1x256xf32>, vector<1x256xf32>, vector<1x256xf32> -> vector<3x256xf32>
    %cst_62 = arith.constant 1.000000e+00 : f32
    %228 = vector.broadcast %cst_62 : f32 to vector<3x256xf32>
    %229 = arith.addf %227, %228 : vector<3x256xf32>
    %cst_63 = arith.constant 5.000000e-01 : f32
    %230 = vector.broadcast %cst_63 : f32 to vector<3x256xf32>
    %231 = arith.mulf %229, %230 : vector<3x256xf32>
    %cst_64 = arith.constant 0.000000e+00 : f32
    %cst_65 = arith.constant 1.000000e+00 : f32
    %232 = vector.broadcast %cst_64 : f32 to vector<3x256xf32>
    %233 = arith.maximumf %232, %231 : vector<3x256xf32>
    %234 = vector.broadcast %cst_65 : f32 to vector<3x256xf32>
    %235 = arith.minimumf %234, %233 : vector<3x256xf32>
    %c0_66 = arith.constant 0 : index
    %c0_67 = arith.constant 0 : index
    %236 = vector.load %arg8[%c0_66, %c0_67] : memref<3x256xf32, #tpu.memory_space<vmem>>, vector<3x256xf32>
    tpu.vector_store %arg8[%c0_66, %c0_67], %235 {strides = array<i32>} : memref<3x256xf32, #tpu.memory_space<vmem>>, vector<3x256xf32>,
    return
  }
  func.func @transform_0(%arg0: i32) -> (i32, i32) {
    %c0_i32 = arith.constant 0 : i32
    %c0_i32_0 = arith.constant 0 : i32
    return %c0_i32, %arg0 : i32, i32
  }
  func.func @transform_1(%arg0: i32) -> (i32, i32) {
    %c0_i32 = arith.constant 0 : i32
    %c0_i32_0 = arith.constant 0 : i32
    return %c0_i32, %arg0 : i32, i32
  }
  func.func @transform_2(%arg0: i32) -> (i32, i32) {
    %c0_i32 = arith.constant 0 : i32
    %c0_i32_0 = arith.constant 0 : i32
    return %c0_i32, %arg0 : i32, i32
  }
  func.func @transform_3(%arg0: i32) -> (i32, i32) {
    %c0_i32 = arith.constant 0 : i32
    %c0_i32_0 = arith.constant 0 : i32
    return %c0_i32, %arg0 : i32, i32
  }
  func.func @transform_4(%arg0: i32) -> (i32, i32) {
    %c0_i32 = arith.constant 0 : i32
    %c0_i32_0 = arith.constant 0 : i32
    %c0_i32_1 = arith.constant 0 : i32
    return %c0_i32, %c0_i32_0 : i32, i32
  }
  func.func @transform_5(%arg0: i32) -> (i32, i32) {
    %c0_i32 = arith.constant 0 : i32
    %c0_i32_0 = arith.constant 0 : i32
    %c0_i32_1 = arith.constant 0 : i32
    return %c0_i32, %c0_i32_0 : i32, i32
  }
  func.func @transform_6(%arg0: i32) -> (i32, i32) {
    %c0_i32 = arith.constant 0 : i32
    %c0_i32_0 = arith.constant 0 : i32
    return %c0_i32, %arg0 : i32, i32
  }
  func.func @transform_7(%arg0: i32) -> (i32, i32) {
    %c0_i32 = arith.constant 0 : i32
    %c0_i32_0 = arith.constant 0 : i32
    return %c0_i32, %arg0 : i32, i32
  }
}

</mosaic_0001>

<bundles_post_ra>
// kernel: dlm_conv2d_forward.3
= control target key start
LH: loop header
LB: loop body
LE: loop exit
PB: predicated region body
PF: predicated region fallthrough
CT: control target
= control target key end

     0   :  { %s2414_s24 = smov 0   ;;  %s2416_s25 = smov 0   ;;  %s3736_s0 = inlined_call_operand.vmem [shape: bf16[4,512], index: 0, kind: input, shape index: {}]   ;;  %s3737_s1 = inlined_call_operand.vmem [shape: f32[3,512], index: 1, kind: input, shape index: {}]   ;;  %s3738_s2 = inlined_call_operand.vmem [shape: f32[10,512], index: 2, kind: input, shape index: {}]   ;;  %s3739_s3 = inlined_call_operand.vmem [shape: f32[3,512], index: 3, kind: input, shape index: {}]   ;;  %s3740_s4 = inlined_call_operand.vmem [shape: bf16[112,4], index: 4, kind: input, shape index: {}]   ;;  %s3741_s5 = inlined_call_operand.vmem [shape: f32[112,1], index: 5, kind: input, shape index: {}]   ;;  %s3742_s6 = inlined_call_operand.vmem [shape: f32[1,512], index: 6, kind: output, shape index: {0}]   ;;  %s3743_s7 = inlined_call_operand.vmem [shape: f32[3,512], index: 7, kind: output, shape index: {1}]  }
   0x1   :  { %s2418_s26 = smov 0  }
   0x2 LB: > { %s2033_s27 = sadd.s32 4294967295, %s2369_s26   ;;  %s2431_s28 = sadd.s32 1, %s2369_s26   ;;  %s2369_s26 = sphi %s2418_s26, %s3989_s26   ;;  %s2365_s25 = sphi %s2416_s25, %s3988_s25   ;;  %s2361_s24 = sphi %s2414_s24, %s3987_s24  }
   0x3   : > { %s74_s29 = ssub.s32 %s2369_s26, %s2431_s28  ;;  %s77_s30 = sadd.s32 1, %s2365_s25 }
   0x4   : > { %p75_p0 = scmp.eq.s32.totalorder %s74_s29, 0  ;;  %p84_p1 = scmp.ne.s32.totalorder %s2365_s25, %s2361_s24 }
   0x5   : > { %p85_p2 = scmp.eq.s32.totalorder %s2369_s26, 0  ;;  %p2036_p4 = scmp.ge.s32.totalorder %s2369_s26, 2 }
   0x6   : > { %s2440_s8 = scalar_select %p75_p0, %s2365_s25, %s77_s30  }
   0x7   : > { %p86_p3 = por %p85_p2, %p84_p1  ;;  %236 = sbr.rel (%p2036_p4) target bundleno = 18 (0x12), region = 24 }
   0xc   : > { %257 = sbr.rel (!%p86_p3) target bundleno = 18 (0x12), region = 36  ;;  %s259_s9 = sand.u32 (%p86_p3), 1, %s2365_s25  }
   0xd   : > { %s2096_s10 = sshll.u32 (%p86_p3), %s2369_s26, 4  ;;  %s2037_s11 = sshll.u32 (%p86_p3), %s259_s9, 5 }
   0xe   : > { %s264_s14 = scalar_lea.vmem (%p86_p3), %s3738_s2, %s2096_s10  ;;  %s261_s15 = scalar_lea.vmem (%p86_p3), [#allocation2], %s2037_s11 }
   0xf   : > { %v277_v0 = vld [vmem:[%s264_s14] sm:$0xff] (%p86_p3)  ;;  %v279_v1 = vld [vmem:[%s264_s14 + $0x8] sm:$0xff] (%p86_p3) }
  0x10   : > { %v281_v2 = vld [vmem:[%s264_s14 + $0x20] sm:$0xff] (%p86_p3)  ;;  %278 = vst [vmem:[%s261_s15] sm:$0xff] (%p86_p3), %v277_v0  ;;  %280 = vst [vmem:[%s261_s15 + $0x8] sm:$0xff] (%p86_p3), %v279_v1  ;;  %v283_v3 = vld [vmem:[%s264_s14 + $0x28] sm:$0xff] (%p86_p3) }
  0x11   : > { %282 = vst [vmem:[%s261_s15 + $0x10] sm:$0xff] %v281_v2  ;;  %284 = vst [vmem:[%s261_s15 + $0x18] sm:$0xff] %v283_v3 }
  0x12 PF: > { %p2040_p5 = scmp.ge.s32.totalorder %s2369_s26, 1  ;;  %p298_p6 = scmp.lt.s32.totalorder %s2369_s26, 3 }
  0x14   : > { %p299_p7 = pnand %p2040_p5, %p298_p6 }
  0x16   : > { %302 = sbr.rel (%p299_p7) target bundleno = 578 (0x242), region = 63 }
  0x1b   : > { %s2042_s16 = sshll.u32 %s2033_s27, 1  ;;  %v3744_v4 = vlaneseq  ;;  %v2371_v5 = vmov 0   ;;  %vm551_vm0 = vcmask 1041408   ;;  %v412_v13 = vld [vmem:[%s3741_s5 + $0x58] sm:$0xff]  ;;  %v2128_v14 = vld [vmem:[%s3740_s4] sm:$0xff]   ;;  %vm529_vm1 = vcmask 31744  }
  0x1c   : > { %p356_p8 = scmp.lt.s32.totalorder %s2042_s16, 3  ;;  %590 = vmatprep.mubr.bf16.mxu0 %v2371_v5  ;;  %630 = vmatprep.mubr.bf16.mxu1 %v2371_v5  ;;  %v2129_v15 = vld [vmem:[%s3740_s4 + $0x20] sm:$0xff]   ;;  %v411_v17 = vld [vmem:[%s3741_s5 + $0x50] sm:$0xff]  ;;  %v408_v18 = vld [vmem:[%s3741_s5 + $0x38] sm:$0xff]  ;;  %s305_s14 = sand.u32 1, %s2361_s24  }
  0x1d   : > { %2126 = vset.pattern.permute.xlu0 %v2371_v5  ;;  %2127 = vset.pattern.permute.xlu1 %v2371_v5  ;;  %v2456_v6 = vshrl.u32 %v3744_v4, 7  ;;  %v413_v16 = vld [vmem:[%s3741_s5 + $0x60] sm:$0xff]  ;;  %v414_v20 = vld [vmem:[%s3741_s5 + $0x68] sm:$0xff]  ;;  %v407_v23 = vld [vmem:[%s3741_s5 + $0x30] sm:$0xff]  ;;  %s2041_s15 = sshll.u32 %s305_s14, 5 }
  0x1e   : > { %s3991_s16 = smov (!%p356_p8, %s2042_s16), 3  ;;  %472 = vperm.xlu0 %2126, %v412_v13   ;;  %477 = vperm.xlu1 %2127, %v413_v16   ;;  %v409_v19 = vld [vmem:[%s3741_s5 + $0x40] sm:$0xff]  ;;  %v2130_v21 = vld [vmem:[%s3740_s4 + $0x8] sm:$0xff]   ;;  %v404_v26 = vld [vmem:[%s3741_s5 + $0x18] sm:$0xff] }
  0x1f   : > { %s2043_s17 = sshll.u32 %s3991_s16, 1  ;;  %3819 = vst [vmem:[#allocation3_spill] sm:$0xff] %v2456_v6  ;;  %s2462_s21 = sshll.u32 %s3991_s16, 2  ;;  %v687_v8 = vsub.s32 4, %v2456_v6  ;;  %v2131_v22 = vld [vmem:[%s3740_s4 + $0x28] sm:$0xff]   ;;  %v405_v25 = vld [vmem:[%s3741_s5 + $0x20] sm:$0xff] }
  0x20   : > { %s359_s20 = scalar_lea.vmem %s3736_s0, %s2043_s17  ;;  %s372_s26 = scalar_lea.vmem %s3739_s3, %s2462_s21  ;;  %v410_v24 = vld [vmem:[%s3741_s5 + $0x48] sm:$0xff]  ;;  %v2132_v27 = vld [vmem:[%s3740_s4 + $0x10] sm:$0xff]   ;;  %v401_v31 = vld [vmem:[%s3741_s5] sm:$0xff]  ;;  %v705_v34 = vsub.s32 5, %v2456_v6  ;;  %v2558_v37 = vsub.s32 2, %v2456_v6  ;;  %v3747_v54 = vsub.s32 6, %v2456_v6 }
  0x21   : > { %v2058_v7 = vld.sshfl [vmem:[%s359_s20] sm:$0x33 pattern:$0x76325410]  ;;  %v2133_v28 = vld [vmem:[%s3740_s4 + $0x30] sm:$0xff]   ;;  %v406_v29 = vld [vmem:[%s3741_s5 + $0x28] sm:$0xff]  ;;  %s365_s19 = scalar_lea.vmem %s3737_s1, %s2462_s21  ;;  %s383_s23 = scalar_lea.vmem %s3743_s7, %s2462_s21 }
  0x22   : > { %v528_v9 = vcombine.high %v2058_v7, %v2058_v7  ;;  %v2469_v10 = vld [vmem:[%s372_s26] sm:$0x77]  ;;  %v553_v11 = vsel %vm551_vm0, %v2058_v7, 0  ;;  %467 = vperm.xlu0 %2126, %v411_v17   ;;  %452 = vperm.xlu1 %2127, %v408_v18   ;;  %v402_v30 = vld [vmem:[%s3741_s5 + $0x8] sm:$0xff]  ;;  %v403_v32 = vld [vmem:[%s3741_s5 + $0x10] sm:$0xff]  ;;  %3823 = vst [vmem:[#allocation7_spill] sm:$0xff] %v2558_v37  ;;  %s377_s27 = scalar_lea.vmem %s3742_s6, %s3991_s16 }
  0x23   : > { %3820 = vst [vmem:[#allocation4_spill] sm:$0xff] %v2469_v10  ;;  %v2475_v12 = vrot.slane %v2469_v10, %v687_v8  ;;  %v2134_v33 = vld [vmem:[%s3740_s4 + $0x18] sm:$0xff]   ;;  %v2553_v35 = vrot.slane %v2469_v10, %v705_v34  ;;  %s307_s17 = scalar_lea.vmem [#allocation2], %s2041_s15  ;;  %v2591_v58 = vrot.slane %v2469_v10, %v3747_v54 }
  0x24   : > { %2059 = vmatprep.subr.msk.bf16.mxu0 %vm551_vm0, %v528_v9  ;;  %2097 = vmatprep.subr.msk.bf16.mxu1 %vm551_vm0, %v528_v9  ;;  %v1454_v57 = vld [vmem:[%s307_s17 + $0x10] sm:$0x3]  ;;  %v1452_v59 = vld [vmem:[%s307_s17] sm:$0xff]  ;;  %v1455_v7 = vld [vmem:[%s307_s17 + $0x18] sm:$0x3] }
  0x25   : > { %3821 = vst [vmem:[#allocation5_spill] sm:$0xff] %v2475_v12  ;;  %573 = vmatpush1.bf16.msra.mxu0 %v553_v11  ;;  %2098 = vmatpush1.bf16.msra.mxu1 %v553_v11  ;;  %3822 = vst [vmem:[#allocation6_spill] sm:$0xff] %v2553_v35  ;;  %v1453_v9 = vld [vmem:[%s307_s17 + $0x8] sm:$0xff] }
  0x26   : > { %457 = vperm.xlu0 %2126, %v409_v19   ;;  %482 = vperm.xlu1 %2127, %v414_v20   ;;  %3826 = vst [vmem:[#allocation10_spill] sm:$0xff] %v2591_v58 }
  0x28   : > { %2060 = vmatmul.mubr.msk.bf16.vlgmr.msra.gmra.mxu0 %vm529_vm1, %v2128_v14  ;;  %2064 = vmatmul.mubr.msk.bf16.vlgmr.msra.gmra.mxu1 %vm529_vm1, %v2129_v15 }
  0x29   : > { %600 = vmatprep.mubr.bf16.mxu0 %v2371_v5  ;;  %640 = vmatprep.mubr.bf16.mxu1 %v2371_v5 }
  0x2a   : > { %447 = vperm.xlu0 %2126, %v407_v23   ;;  %462 = vperm.xlu1 %2127, %v410_v24  }
  0x2e   : > { %437 = vperm.xlu0 %2126, %v405_v25   ;;  %432 = vperm.xlu1 %2127, %v404_v26  }
  0x30   : > { %2061 = vmatmul.mubr.msk.bf16.gmra.mxu0 %vm529_vm1, %v2130_v21  ;;  %2065 = vmatmul.mubr.msk.bf16.gmra.mxu1 %vm529_vm1, %v2131_v22 }
  0x31   : > { %610 = vmatprep.mubr.bf16.mxu0 %v2371_v5  ;;  %650 = vmatprep.mubr.bf16.mxu1 %v2371_v5 }
  0x32   : > { %442 = vperm.xlu0 %2126, %v406_v29   ;;  %422 = vperm.xlu1 %2127, %v402_v30  }
  0x36   : > { %417 = vperm.xlu0 %2126, %v401_v31   ;;  %427 = vperm.xlu1 %2127, %v403_v32  }
  0x38   : > { %2062 = vmatmul.mubr.msk.bf16.gmra.mxu0 %vm529_vm1, %v2132_v27  ;;  %2066 = vmatmul.mubr.msk.bf16.gmra.mxu1 %vm529_vm1, %v2133_v28 }
  0x39   : > { %620 = vmatprep.mubr.bf16.mxu0 %v2371_v5 }
  0x40   : > { %2063 = vmatmul.mubr.msk.bf16.gmra.mxu0 %vm529_vm1, %v2134_v33 }
  0x99   : > { %v2555_v36 = vpop.permute.xlu0 %472  ;;  %v2564_v40 = vpop.permute.xlu1 %477 }
  0x9d   : > { %v2562_v39 = vpop.permute.xlu0 %467  ;;  %v2568_v42 = vpop.permute.xlu1 %452 }
  0x9e   : > { %3824 = vst [vmem:[#allocation8_spill] sm:$0xff] %v2568_v42 }
  0xa1   : > { %v2566_v41 = vpop.permute.xlu0 %457  ;;  %v2572_v44 = vpop.permute.xlu1 %482 }
  0xa5   : > { %v2570_v43 = vpop.permute.xlu0 %447  ;;  %v2576_v46 = vpop.permute.xlu1 %462 }
  0xa9   : > { %v2574_v45 = vpop.permute.xlu0 %437  ;;  %v2580_v48 = vpop.permute.xlu1 %432 }
  0xad   : > { %v2578_v47 = vpop.permute.xlu0 %442  ;;  %v423_v53 = vpop.permute.xlu1 %422 }
  0xb1   : > { %v418_v50 = vpop.permute.xlu0 %417  ;;  %v428_v4 = vpop.permute.xlu1 %427 }
  0xe8   : > { %v592_v49 = vpop.f32.mrf.mxu0  ;;  %v2583_v51 = vpop.f32.mrf.mxu1 }
  0xe9   : > { %v2586_v55 = vadd.f32 %v592_v49, %v418_v50 }
  0xea   : > { %v594_v52 = vpop.f32.mrf.mxu0  ;;  %v2593_v60 = vpop.f32.mrf.mxu1 }
  0xeb   : > { %3825 = vst [vmem:[#allocation9_spill] sm:$0xff] %v2586_v55  ;;  %v1456_v1 = vadd.f32 %v1452_v59, %v2586_v55  ;;  %v2601_v2 = vadd.f32 %v594_v52, %v418_v50  ;;  %v2618_v59 = vadd.s32 8, %v2456_v6 }
  0xec   : > { %v596_v56 = vpop.f32.mrf.mxu0  ;;  %v2607_v13 = vpop.f32.mrf.mxu1 }
  0xed   : > { %v2595_v61 = vadd.f32 %v596_v56, %v423_v53  ;;  %3828 = vst [vmem:[#allocation12_spill] sm:$0xff] %v2601_v2  ;;  %v1457_v19 = vadd.f32 %v1453_v9, %v2601_v2 }
  0xee   : > { %v598_v62 = vpop.f32.mrf.mxu0  ;;  %v2615_v24 = vpop.f32.mrf.mxu1 }
  0xef   : > { %3827 = vst [vmem:[#allocation11_spill] sm:$0xff] %v2595_v61  ;;  %v1286_v63 = vsel %vm551_vm0, %v2595_v61, -inf  ;;  %v1458_v0 = vadd.f32 %v1454_v57, %v2595_v61  ;;  %v2604_v5 = vadd.f32 %v598_v62, %v423_v53 }
  0xf0   : > { %v1287_v3 = vmax.f32 %v2586_v55, %v1286_v63  ;;  %v642_v33 = vpop.f32.mrf.mxu1 }
  0xf1   : > { %3829 = vst [vmem:[#allocation13_spill] sm:$0xff] %v2604_v5  ;;  %v1460_v11 = vsel %vm551_vm0, %v1458_v0, -inf  ;;  %v1294_v16 = vsel %vm551_vm0, %v2604_v5, -inf  ;;  %v1459_v18 = vadd.f32 %v1455_v7, %v2604_v5 }
  0xf2   : > { %v1288_v14 = vrot.slane %v1287_v3, 4  ;;  %v1461_v15 = vmax.f32 %v1456_v1, %v1460_v11  ;;  %v1295_v17 = vmax.f32 %v2601_v2, %v1294_v16  ;;  %v644_v62 = vpop.f32.mrf.mxu1 }
  0xf3   : > { %v1468_v23 = vsel %vm551_vm0, %v1459_v18, -inf }
  0xf4   : > { %v1289_v20 = vmax.f32 %v1287_v3, %v1288_v14  ;;  %v1462_v21 = vrot.slane %v1461_v15, 4  ;;  %v1296_v22 = vrot.slane %v1295_v17, 4  ;;  %v1469_v27 = vmax.f32 %v1457_v19, %v1468_v23 }
  0xf6   : > { %v1290_v25 = vrot.slane %v1289_v20, 2  ;;  %v1463_v26 = vmax.f32 %v1461_v15, %v1462_v21  ;;  %v1297_v28 = vmax.f32 %v1295_v17, %v1296_v22  ;;  %v1470_v31 = vrot.slane %v1469_v27, 4  ;;  %v646_v15 = vpop.f32.mrf.mxu1 }
  0xf8   : > { %v1291_v29 = vmax.f32 %v1289_v20, %v1290_v25  ;;  %v1464_v30 = vrot.slane %v1463_v26, 2  ;;  %v1298_v32 = vrot.slane %v1297_v28, 2  ;;  %v1471_v52 = vmax.f32 %v1469_v27, %v1470_v31 }
  0xfa   : > { %v1292_v49 = vrot.slane %v1291_v29, 1  ;;  %v1465_v50 = vmax.f32 %v1463_v26, %v1464_v30  ;;  %v1299_v53 = vmax.f32 %v1297_v28, %v1298_v32  ;;  %v1472_v57 = vrot.slane %v1471_v52, 2 }
  0xfb   : > { %v643_v30 = vadd.f32 %v642_v33, %v2562_v39  ;;  %v2644_v33 = vpop.f32.mrf.mxu0 }
  0xfc   : > { %v1466_v56 = vrot.slane %v1465_v50, 1  ;;  %v2620_v63 = vmax.f32 %v1291_v29, %v1292_v49  ;;  %v1300_v7 = vrot.slane %v1299_v53, 1  ;;  %v1473_v9 = vmax.f32 %v1471_v52, %v1472_v57  ;;  %v648_v57 = vpop.f32.mrf.mxu1 }
  0xfe   : > { %v1467_v3 = vmax.f32 %v1465_v50, %v1466_v56  ;;  %v1304_v16 = vsub.f32 %v2595_v61, %v2620_v63  ;;  %v2627_v20 = vmax.f32 %v1299_v53, %v1300_v7  ;;  %v1474_v21 = vrot.slane %v1473_v9, 1  ;;  %v661_v53 = vld [vmem:[%s365_s19] sm:$0x77] }
 0x100   : > { %vm1479_vm2 = vcmp.ge.f32.partialorder %v1456_v1, %v1467_v3  ;;  %vm1481_vm3 = vcmp.ge.f32.partialorder %v1458_v0, %v1467_v3  ;;  %v1475_v23 = vmax.f32 %v1473_v9, %v1474_v21  ;;  %v647_v1 = vadd.f32 %v646_v15, %v2555_v36 }
 0x101   : > { %v1483_v11 = vsel %vm1479_vm2, %v2456_v6, 10  ;;  %v1485_v14 = vsel %vm1481_vm3, %v2618_v59, 10  ;;  %v1302_v0 = vsub.f32 %v2586_v55, %v2620_v63  ;;  %v1310_v26 = vmul.f32 1.442695, %v1304_v16  ;;  %v2647_v16 = vpop.f32.mrf.mxu0 }
 0x102   : > { %v1487_v17 = vsel %vm551_vm0, %v1485_v14, 2147483647  ;;  %v1305_v27 = vsub.f32 %v2604_v5, %v2627_v20  ;;  %vm1480_vm5 = vcmp.ge.f32.partialorder %v1457_v19, %v1475_v23  ;;  %vm1482_vm6 = vcmp.ge.f32.partialorder %v1459_v18, %v1475_v23 }
 0x103   : > { %vm1488_vm4 = vcmp.lt.s32.totalorder %v1483_v11, %v1487_v17  ;;  %v1484_v28 = vsel %vm1480_vm5, %v2456_v6, 10  ;;  %v1486_v29 = vsel %vm1482_vm6, %v2618_v59, 10  ;;  %2135 = vtanh.f32 %v647_v1 }
 0x104   : > { %v1489_v22 = vsel %vm1488_vm4, %v1483_v11, %v1487_v17  ;;  %v1499_v31 = vsel %vm551_vm0, %v1486_v29, 2147483647  ;;  %v1306_v49 = vmul.f32 1.442695, %v1302_v0  ;;  %v1303_v19 = vsub.f32 %v2601_v2, %v2627_v20 }
 0x105   : > { %v1490_v25 = vrot.slane %v1489_v22, 4  ;;  %vm1500_vm8 = vcmp.lt.s32.totalorder %v1484_v28, %v1499_v31  ;;  %2137 = vpow2.f32 %v1310_v26  ;;  %v1312_v50 = vmul.f32 1.442695, %v1305_v27 }
 0x106   : > { %v1501_v52 = vsel %vm1500_vm8, %v1484_v28, %v1499_v31  ;;  %2139 = vtanh.f32 %v643_v30  ;;  %v1308_v7 = vmul.f32 1.442695, %v1303_v19  ;;  %v662_v11 = vmul.f32 2.0, %v661_v53 }
 0x107   : > { %vm1491_vm7 = vcmp.lt.s32.totalorder %v1489_v22, %v1490_v25  ;;  %v1502_v56 = vrot.slane %v1501_v52, 4  ;;  %2141 = vpow2.f32 %v1306_v49  ;;  %v649_v15 = vadd.f32 %v648_v57, %v2555_v36 }
 0x108   : > { %v1492_v32 = vsel %vm1491_vm7, %v1489_v22, %v1490_v25  ;;  %2143 = vpow2.f32 %v1312_v50  ;;  %v645_v21 = vadd.f32 %v644_v62, %v2562_v39  ;;  %v2653_v23 = vsub.s32 0, %v2456_v6  ;;  %v2659_v39 = vpop.f32.mrf.mxu0 }
 0x109   : > { %v1493_v18 = vrot.slane %v1492_v32, 2  ;;  %vm1503_vm10 = vcmp.lt.s32.totalorder %v1501_v52, %v1502_v56  ;;  %2145 = vpow2.f32 %v1308_v7  ;;  %v2372_v1 = vmov 0.0  }
 0x10a   : > { %v1504_v14 = vsel %vm1503_vm10, %v1501_v52, %v1502_v56  ;;  %3830 = vst [vmem:[#allocation14_spill] sm:$0xff] %v2653_v23  ;;  %2147 = vtanh.f32 %v649_v15  ;;  %v2657_v25 = vadd.f32 -1.0, %v662_v11  ;;  %v2663_v27 = vsub.s32 1, %v2456_v6  ;;  %v2691_v56 = vpop.f32.mrf.mxu0 }
 0x10b   : > { %vm1494_vm9 = vcmp.lt.s32.totalorder %v1492_v32, %v1493_v18  ;;  %v1505_v17 = vrot.slane %v1504_v14, 2  ;;  %2149 = vtanh.f32 %v645_v21  ;;  %v635_v52 = vadd.f32 %v2593_v60, %v2566_v41 }
 0x10c   : > { %v1495_v3 = vsel %vm1494_vm9, %v1492_v32, %v1493_v18  ;;  %3832 = vst [vmem:[#allocation16_spill] sm:$0xff] %v2663_v27  ;;  %v633_v32 = vadd.f32 %v2583_v51, %v2566_v41  ;;  %v688_v50 = vrot.slane %v2657_v25, %v687_v8  ;;  %v684_v53 = vrot.slane %v2657_v25, %v2653_v23 }
 0x10d   : > { %v1496_v9 = vrot.slane %v1495_v3, 1  ;;  %vm1506_vm13 = vcmp.lt.s32.totalorder %v1504_v14, %v1505_v17  ;;  %v639_v8 = vadd.f32 %v2615_v24, %v2576_v46  ;;  %v702_v41 = vrot.slane %v2657_v25, %v2663_v27 }
 0x10e   : > { %v1507_v36 = vsel %vm1506_vm13, %v1504_v14, %v1505_v17  ;;  %v706_v11 = vrot.slane %v2657_v25, %v705_v34  ;;  %v652_v14 = vpop.f32.mrf.mxu1  ;;  %v2715_v21 = vmax.f32 %v635_v52, -7.0  ;;  %vm737_vm3 = vcmask 1043456  }
 0x10f   : > { %vm1497_vm11 = vcmp.lt.s32.totalorder %v1495_v3, %v1496_v9  ;;  %v1508_v26 = vrot.slane %v1507_v36, 1  ;;  %v2771_v12 = vadd.f32 %v2647_v16, %v428_v4  ;;  %vm1348_vm4 = vcmask 1045504  }
 0x110   : > { %v1498_v22 = vsel %vm1497_vm11, %v1495_v3, %v1496_v9  ;;  %v2667_v29 = vpop.eup %2135  ;;  %v637_v3 = vadd.f32 %v2607_v13, %v2576_v46  ;;  %v720_v9 = vrot.slane %v2657_v25, %v2558_v37  ;;  %v2709_v13 = vmax.f32 %v633_v32, -7.0  ;;  %3835 = vst [vmem:[#allocation19_spill] sm:$0xff] %v2715_v21 }
 0x111   : > { %vm1511_vm12 = vcmp.eq.s32.totalorder %v2456_v6, %v1498_v22  ;;  %vm1513_vm14 = vcmp.eq.s32.totalorder %v2618_v59, %v1498_v22  ;;  %vm1509_vm15 = vcmp.lt.s32.totalorder %v1507_v36, %v1508_v26  ;;  %v2718_v22 = vrot.slane %v684_v53, %v2653_v23 }
 0x112   : > { %v2655_v0 = vsel %vm1511_vm12, 1.0, %v2372_v1  ;;  %v2665_v28 = vsel %vm1513_vm14, 1.0, %v2372_v1  ;;  %v1510_v49 = vsel %vm1509_vm15, %v1507_v36, %v1508_v26  ;;  %v2138_v18 = vpop.eup %2137  ;;  %v2721_v36 = vrot.slane %v688_v50, %v2653_v23  ;;  %v2725_v26 = vpop.f32.mrf.mxu0 }
 0x113   : > { %3831 = vst [vmem:[#allocation15_spill] sm:$0xff] %v2655_v0  ;;  %v3746_v62 = vrot.slane %v2655_v0, 6  ;;  %vm1512_vm1 = vcmp.eq.s32.totalorder %v2456_v6, %v1510_v49  ;;  %v2140_v51 = vpop.eup %2139  ;;  %v1314_v46 = vsel %vm551_vm0, %v2138_v18, 0.0  ;;  %vm1514_vm2 = vcmp.eq.s32.totalorder %v2618_v59, %v1510_v49  ;;  %3836 = vst [vmem:[#allocation20_spill] sm:$0xff] %v2718_v22 }
 0x114   : > { %v1567_v60 = vmul.f32 %v2140_v51, %v2655_v0  ;;  %v2702_v7 = vsel %vm1512_vm1, 1.0, %v2372_v1  ;;  %v2142_v15 = vpop.eup %2141  ;;  %3837 = vst [vmem:[#allocation21_spill] sm:$0xff] %v2721_v36  ;;  %v2727_v32 = vmax.f32 %v637_v3, -7.0  ;;  %v2729_v18 = vmax.f32 %v639_v8, -7.0 }
 0x115   : > { %v2673_v30 = vsel %vm551_vm0, %v2665_v28, %v3746_v62  ;;  %3834 = vst [vmem:[#allocation18_spill] sm:$0xff] %v2702_v7  ;;  %v2144_v17 = vpop.eup %2143  ;;  %v3745_v59 = vrot.slane %v2702_v7, 6  ;;  %v653_v49 = vadd.f32 %v652_v14, %v2564_v40  ;;  %v1315_v52 = vadd.f32 %v2142_v15, %v1314_v46  ;;  %v2759_v46 = vpop.f32.mrf.mxu0 }
 0x116   : > { %3833 = vst [vmem:[#allocation17_spill] sm:$0xff] %v2673_v30  ;;  %v2681_v19 = vmul.f32 %v2667_v29, %v2673_v30  ;;  %3838 = vst [vmem:[#allocation22_spill] sm:$0xff] %v2729_v18  ;;  %v2734_v53 = vrot.slane %v702_v41, %v2663_v27  ;;  %v2737_v50 = vrot.slane %v706_v11, %v2663_v27  ;;  %v802_v3 = vsub.f32 0.0, %v2709_v13 }
 0x117   : > { %v1322_v8 = vsel %vm551_vm0, %v2144_v17, 0.0  ;;  %v2744_v57 = vrot.slane %v720_v9, %v2558_v37  ;;  %v803_v11 = vsub.f32 0.0, %v2715_v21  ;;  %v2757_v15 = vmul.f32 %v2140_v51, %v2718_v22 }
 0x118   : > { %v1723_v24 = vsel %vm551_vm0, %v2681_v19, 0.0  ;;  %v804_v17 = vsub.f32 0.0, %v2727_v32  ;;  %v805_v31 = vsub.f32 0.0, %v2729_v18  ;;  %2151 = vtanh.f32 %v653_v49 }
 0x119   : > { %v2723_v34 = vadd.f32 %v1723_v24, %v1567_v60  ;;  %v2739_v60 = vsel %vm1514_vm2, 1.0, %v2372_v1  ;;  %v2146_v24 = vpop.eup %2145  ;;  %3839 = vst [vmem:[#allocation23_spill] sm:$0xff] %v2744_v57  ;;  %v603_v1 = vadd.f32 %v2644_v33, %v428_v4  ;;  %v1316_v62 = vrot.slane %v1315_v52, 4 }
 0x11a   : > { %v2750_v14 = vsel %vm551_vm0, %v2739_v60, %v3745_v59  ;;  %v2752_v41 = vpop.eup %2147  ;;  %v654_v59 = vpop.f32.mrf.mxu1  ;;  %v1323_v54 = vadd.f32 %v2146_v24, %v1322_v8  ;;  %v607_v51 = vadd.f32 %v2659_v39, %v2580_v48  ;;  %v814_v35 = vmul.f32 1.442695, %v802_v3 }
 0x11b   : > { %3840 = vst [vmem:[#allocation24_spill] sm:$0xff] %v2750_v14  ;;  %v2150_v9 = vpop.eup %2149  ;;  %v2765_v38 = vmul.f32 %v2752_v41, %v2750_v14  ;;  %v3841_v27 = vsub.s32 6, %v2456_v6  ;;  %v816_v49 = vmul.f32 1.442695, %v803_v11  ;;  %v616_v39 = vpop.f32.mrf.mxu0  ;;  %v818_v3 = vmul.f32 1.442695, %v804_v17 }
 0x11c   : > { %v1568_v33 = vmul.f32 %v2150_v9, %v2702_v7  ;;  %v2780_v24 = vmul.f32 %v2673_v30, %v607_v51  ;;  %v2785_v4 = vsub.f32 %v2718_v22, %v603_v1  ;;  %v2790_v16 = vsel %vm551_vm0, %v2718_v22, %v2734_v53 }
 0x11d   : > { %v1731_v58 = vsel %vm551_vm0, %v2765_v38, 0.0  ;;  %v724_v23 = vrot.slane %v2657_v25, %v3841_v27  ;;  %3843 = vst [vmem:[#allocation26_spill] sm:$0xff] %v2790_v16  ;;  %v2793_v25 = vmul.f32 %v2150_v9, %v2721_v36  ;;  %v656_v27 = vpop.f32.mrf.mxu1  ;;  %v1317_v11 = vadd.f32 %v1316_v62, %v1315_v52  ;;  %v618_v30 = vpop.f32.mrf.mxu0 }
 0x11e   : > { %v2782_v8 = vadd.f32 %v1731_v58, %v1568_v33  ;;  %3842 = vst [vmem:[#allocation25_spill] sm:$0xff] %v2785_v4  ;;  %v1324_v10 = vrot.slane %v1323_v54, 4  ;;  %v820_v6 = vmul.f32 1.442695, %v805_v31  ;;  %v2798_v58 = vsel %vm551_vm0, %v2721_v36, %v2737_v50 }
 0x11f   : > { %3844 = vst [vmem:[#allocation27_spill] sm:$0xff] %v2798_v58  ;;  %2153 = vpow2.f32 %v814_v35  ;;  %v2802_v17 = vsub.f32 %v2721_v36, %v2771_v12  ;;  %v2807_v33 = vsel %vm737_vm3, %v2734_v53, %v2744_v57  ;;  %v2810_v9 = vrot.slane %v724_v23, %v2558_v37 }
 0x120   : > { %3846 = vst [vmem:[#allocation29_spill] sm:$0xff] %v2807_v33  ;;  %2155 = vpow2.f32 %v816_v49  ;;  %v3848_v62 = vrot.slane %v2757_v15, 6  ;;  %v1575_v52 = vsel %vm551_vm0, %v2780_v24, 0.0  ;;  %v657_v35 = vadd.f32 %v656_v27, %v2572_v44 }
 0x121   : > { %3845 = vst [vmem:[#allocation28_spill] sm:$0xff] %v2802_v17  ;;  %3847 = vst [vmem:[#allocation30_spill] sm:$0xff] %v2810_v9  ;;  %2157 = vpow2.f32 %v818_v3  ;;  %v2818_v42 = vadd.f32 0.003921569, %v2785_v4  ;;  %v1551_v5 = vmul.f32 %v2655_v0, %v603_v1  ;;  %v1318_v23 = vrot.slane %v1317_v11, 2 }
 0x122   : > { %v758_v31 = vadd.f32 %v3848_v62, %v607_v51  ;;  %v1325_v37 = vadd.f32 %v1324_v10, %v1323_v54  ;;  %2159 = vpow2.f32 %v820_v6  ;;  %v2823_v49 = vadd.f32 -0.003921569, %v2785_v4  ;;  %v658_v62 = vpop.f32.mrf.mxu1  ;;  %v622_v10 = vpop.f32.mrf.mxu0 }
 0x123   : > { %3849 = vst [vmem:[#allocation31_spill] sm:$0xff] %v2818_v42  ;;  %v2826_v9 = vadd.f32 0.003921569, %v2802_v17  ;;  %v1529_v27 = vrot.slane %v2665_v28, 6  ;;  %v1576_v3 = vadd.f32 %v1575_v52, %v1551_v5  ;;  %v609_v42 = vadd.f32 %v2691_v56, %v2580_v48 }
 0x124   : > { %v786_v1 = vsel %vm551_vm0, %v607_v51, %v758_v31  ;;  %v742_v2 = vmul.f32 %v2667_v29, %v2718_v22  ;;  %v655_v6 = vadd.f32 %v654_v59, %v2564_v40  ;;  %2161 = vtanh.f32 %v657_v35 }
 0x125   : > { %3850 = vst [vmem:[#allocation32_spill] sm:$0xff] %v2826_v9  ;;  %v2836_v54 = vadd.f32 -0.003921569, %v2802_v17  ;;  %v3851_v9 = vrot.slane %v2793_v25, 6  ;;  %v2842_v5 = vadd.f32 %v2725_v26, %v2574_v45  ;;  %v659_v48 = vadd.f32 %v658_v62, %v2572_v44  ;;  %v2152_v56 = vpop.eup %2151 }
 0x126   : > { %v1319_v51 = vadd.f32 %v1318_v23, %v1317_v11  ;;  %v1326_v31 = vrot.slane %v1325_v37, 2  ;;  %v1537_v29 = vrot.slane %v2655_v0, 4  ;;  %v2848_v40 = vadd.f32 %v2759_v46, %v2574_v45  ;;  %v624_v45 = vpop.f32.mrf.mxu0 }
 0x127   : > { %v759_v4 = vadd.f32 %v3851_v9, %v609_v42  ;;  %v2851_v59 = vsub.f32 %v2790_v16, %v786_v1  ;;  %v1577_v52 = vrot.slane %v1576_v3, 4  ;;  %v3853_v9 = vrot.slane %v2655_v0, 6 }
 0x128   : > { %v623_v35 = vadd.f32 %v622_v10, %v2570_v43  ;;  %v2858_v44 = vmul.f32 %v2750_v14, %v609_v42  ;;  %v750_v11 = vrot.slane %v742_v2, 6  ;;  %2163 = vtanh.f32 %v655_v6 }
 0x129   : > { %3852 = vst [vmem:[#allocation33_spill] sm:$0xff] %v2851_v59  ;;  %v1530_v26 = vsel %vm551_vm0, %v3853_v9, %v1529_v27  ;;  %v2861_v23 = vadd.f32 %v616_v39, %v2578_v47  ;;  %v787_v46 = vsel %vm551_vm0, %v609_v42, %v759_v4  ;;  %v762_v62 = vmul.f32 %v2152_v56, %v2718_v22 }
 0x12a   : > { %v2866_v1 = vadd.f32 %v618_v30, %v2578_v47  ;;  %2165 = vtanh.f32 %v659_v48  ;;  %v1320_v27 = vrot.slane %v1319_v51, 1  ;;  %v1327_v10 = vadd.f32 %v1326_v31, %v1325_v37 }
 0x12b   : > { %v1725_v9 = vrot.slane %v2723_v34, 4  ;;  %v1549_v2 = vsel %vm737_vm3, %v1530_v26, %v1537_v29  ;;  %v2871_v6 = vadd.f32 0.003921569, %v2851_v59  ;;  %v1578_v39 = vadd.f32 %v1577_v52, %v1576_v3 }
 0x12c   : > { %v2873_v14 = vmax.f32 %v623_v35, -7.0  ;;  %v2876_v42 = vadd.f32 %v624_v45, %v2570_v43  ;;  %v2878_v4 = vpop.eup %2153  ;;  %v2881_v47 = vadd.f32 -0.003921569, %v2851_v59  ;;  %v2884_v37 = vsub.f32 %v2798_v58, %v787_v46 }
 0x12d   : > { %v1583_v30 = vsel %vm551_vm0, %v2858_v44, 0.0  ;;  %v3856_v48 = vrot.slane %v2757_v15, 6  ;;  %v2891_v31 = vpop.eup %2155  ;;  %v1552_v43 = vmul.f32 %v2702_v7, %v2771_v12  ;;  %v774_v52 = vadd.f32 %v750_v11, %v2842_v5 }
 0x12e   : > { %3854 = vst [vmem:[#allocation34_spill] sm:$0xff] %v2881_v47  ;;  %3855 = vst [vmem:[#allocation35_spill] sm:$0xff] %v2884_v37  ;;  %v766_v26 = vrot.slane %v762_v62, 6  ;;  %v1571_v35 = vmul.f32 %v2152_v56, %v1549_v2  ;;  %v2896_v45 = vpop.eup %2157  ;;  %v1321_v46 = vadd.f32 %v1320_v27, %v1319_v51  ;;  %v1328_v58 = vrot.slane %v1327_v10, 1 }
 0x12f   : > { %v751_v3 = vsel %vm551_vm0, %v3856_v48, %v750_v11  ;;  %3857 = vst [vmem:[#allocation36_spill] sm:$0xff] %v2891_v31  ;;  %v1726_v16 = vadd.f32 %v1725_v9, %v2723_v34  ;;  %v1539_v22 = vrot.slane %v2665_v28, 4  ;;  %v2900_v15 = vpop.eup %2159  ;;  %v1579_v48 = vrot.slane %v1578_v39, 2 }
 0x130   : > { %v1743_v31 = vrot.slane %v2681_v19, 2  ;;  %v1584_v0 = vadd.f32 %v1583_v30, %v1552_v43  ;;  %v760_v12 = vadd.f32 %v751_v3, %v2842_v5  ;;  %v2905_v59 = vadd.f32 0.003921569, %v2884_v37 }
 0x131   : > { %v2908_v62 = vadd.f32 -0.003921569, %v2884_v37  ;;  %v1531_v51 = vrot.slane %v2739_v60, 6  ;;  %v1744_v27 = vrot.slane %v1571_v35, 2  ;;  %v2162_v34 = vpop.eup %2161  ;;  %v1595_v28 = vrot.slane %v2780_v24, 2 }
 0x132   : > { %3858 = vst [vmem:[#allocation37_spill] sm:$0xff] %v2905_v59  ;;  %v778_v9 = vmul.f32 %v2152_v56, %v2734_v53  ;;  %v743_v19 = vmul.f32 %v2752_v41, %v2721_v36  ;;  %v767_v30 = vsel %vm551_vm0, %v750_v11, %v766_v26  ;;  %2167 = vlog2.f32 %v1321_v46 }
 0x133   : > { %3859 = vst [vmem:[#allocation38_spill] sm:$0xff] %v2908_v62  ;;  %v1329_v3 = vadd.f32 %v1328_v58, %v1327_v10  ;;  %v1727_v43 = vrot.slane %v1726_v16, 2  ;;  %v1540_v59 = vsel %vm737_vm3, %v1537_v29, %v1539_v22  ;;  %v1580_v37 = vadd.f32 %v1579_v48, %v1578_v39 }
 0x134   : > { %v1585_v62 = vrot.slane %v1584_v0, 4  ;;  %v3774_v17 = vrot.slane %v2702_v7, 4  ;;  %v1745_v47 = vsel %vm1348_vm4, %v1743_v31, %v1744_v27  ;;  %v2920_v24 = vmul.f32 %v1549_v2, %v2842_v5 }
 0x135   : > { %v3860_v56 = vrot.slane %v2702_v7, 6  ;;  %v776_v11 = vadd.f32 %v767_v30, %v2861_v23  ;;  %v780_v58 = vmul.f32 %v2162_v34, %v2734_v53  ;;  %v2927_v10 = vpop.eup %2163  ;;  %v1598_v22 = vrot.slane %v2858_v44, 2 }
 0x136   : > { %v1733_v29 = vrot.slane %v2782_v8, 4  ;;  %v782_v39 = vadd.f32 %v778_v9, %v774_v52  ;;  %v1573_v26 = vmul.f32 %v2162_v34, %v1540_v59  ;;  %v1728_v5 = vadd.f32 %v1727_v43, %v1726_v16 }
 0x137   : > { %v1532_v41 = vsel %vm551_vm0, %v3860_v56, %v1531_v51  ;;  %v2931_v31 = vpop.eup %2165  ;;  %v2934_v46 = vmul.f32 %v1549_v2, %v2709_v13  ;;  %v1565_v48 = vmul.f32 %v1540_v59, %v2727_v32  ;;  %v1753_v51 = vsel %vm551_vm0, %v1744_v27, 0.0 }
 0x138   : > { %v1586_v30 = vadd.f32 %v1585_v62, %v1584_v0  ;;  %v1550_v44 = vsel %vm737_vm3, %v1532_v41, %v3774_v17  ;;  %v1771_v56 = vrot.slane %v1571_v35, 4  ;;  %2169 = vlog2.f32 %v1329_v3 }
 0x139   : > { %v1581_v52 = vrot.slane %v1580_v37, 1  ;;  %v1596_v34 = vrot.slane %v2920_v24, 2  ;;  %v784_v16 = vadd.f32 %v780_v58, %v776_v11  ;;  %v1734_v2 = vadd.f32 %v1733_v29, %v2782_v8 }
 0x13a   : > { %v788_v9 = vsel %vm737_vm3, %v760_v12, %v782_v39  ;;  %v2945_v43 = vadd.f32 %v1753_v51, %v1745_v47  ;;  %v1772_v27 = vrot.slane %v1573_v26, 4  ;;  %v1729_v0 = vrot.slane %v1728_v5, 1 }
 0x13b   : > { %v1697_v62 = vrot.slane %v2934_v46, 4  ;;  %v2949_v53 = vmul.f32 %v1550_v44, %v2848_v40  ;;  %v1698_v41 = vrot.slane %v1565_v48, 4  ;;  %v1587_v35 = vrot.slane %v1586_v30, 2 }
 0x13c   : > { %v752_v3 = vrot.slane %v743_v19, 6  ;;  %v1773_v17 = vsel %vm737_vm3, %v1771_v56, %v1772_v27  ;;  %v1781_v11 = vsel %vm551_vm0, %v1772_v27, 0.0  ;;  %v1597_v8 = vsel %vm1348_vm4, %v1595_v28, %v1596_v34 }
 0x13d   : > { %v1605_v12 = vsel %vm551_vm0, %v1596_v34, 0.0  ;;  %v2956_v47 = vsub.f32 %v2744_v57, %v784_v16  ;;  %v2958_v58 = vadd.f32 %v1781_v11, %v1773_v17  ;;  %v2960_v29 = vadd.f32 %v1581_v52, %v1580_v37 }
 0x13e   : > { %v1735_v39 = vrot.slane %v1734_v2, 2  ;;  %v3775_v26 = vrot.slane %v2934_v46, 2  ;;  %v2964_v19 = vsub.f32 %v2807_v33, %v788_v9  ;;  %v1599_v48 = vrot.slane %v2949_v53, 2 }
 0x13f   : > { %3861 = vst [vmem:[#allocation39_spill] sm:$0xff] %v2960_v29  ;;  %v1557_v51 = vmul.f32 %v1540_v59, %v2861_v23  ;;  %v1699_v28 = vsel %vm737_vm3, %v1697_v62, %v1698_v41  ;;  %v1707_v56 = vsel %vm551_vm0, %v1698_v41, 0.0  ;;  %v2168_v34 = vpop.eup %2167  ;;  %v2970_v16 = vadd.f32 %v1729_v0, %v1728_v5 }
 0x140   : > { %v1606_v17 = vadd.f32 %v1605_v12, %v1597_v8  ;;  %v1623_v37 = vrot.slane %v2920_v24, 4  ;;  %v763_v52 = vmul.f32 %v2927_v10, %v2721_v36  ;;  %v1588_v27 = vadd.f32 %v1587_v35, %v1586_v30 }
 0x141   : > { %3862 = vst [vmem:[#allocation40_spill] sm:$0xff] %v2970_v16  ;;  %v3863_v9 = vrot.slane %v2793_v25, 6  ;;  %v2074_v59 = vadd.f32 -0.003921569, %v2956_v47  ;;  %v1541_v23 = vrot.slane %v2739_v60, 4  ;;  %v1736_v62 = vadd.f32 %v1735_v39, %v1734_v2 }
 0x142   : > { %v2983_v5 = vsel %vm551_vm0, %v3775_v26, 0.0  ;;  %v1708_v0 = vadd.f32 %v1707_v56, %v1699_v28  ;;  %v1572_v24 = vmul.f32 %v2927_v10, %v1550_v44  ;;  %v775_v41 = vadd.f32 %v752_v3, %v2848_v40 }
 0x143   : > { %v753_v11 = vsel %vm551_vm0, %v3863_v9, %v752_v3  ;;  %v1600_v30 = vsel %vm1348_vm4, %v1598_v22, %v1599_v48  ;;  %v1613_v25 = vsel %vm551_vm0, %v1599_v48, 0.0  ;;  %v1624_v35 = vrot.slane %v1557_v51, 4 }
 0x144   : > { %v1607_v8 = vrot.slane %v1606_v17, 4  ;;  %v2990_v12 = vadd.f32 %v753_v11, %v2848_v40  ;;  %v768_v60 = vrot.slane %v763_v52, 6  ;;  %v1747_v2 = vrot.slane %v1572_v24, 2 }
 0x145   : > { %v1589_v39 = vrot.slane %v1588_v27, 1  ;;  %v779_v9 = vmul.f32 %v2927_v10, %v2737_v50  ;;  %v2995_v28 = vmul.f32 %v2896_v45, %v2074_v59  ;;  %v3864_v56 = vrot.slane %v2702_v7, 4  ;;  %v2170_v48 = vpop.eup %2169 }
 0x146   : > { %v1737_v51 = vrot.slane %v1736_v62, 1  ;;  %v3003_v26 = vmul.f32 %v1550_v44, %v2715_v21  ;;  %v1614_v40 = vadd.f32 %v1613_v25, %v1600_v30  ;;  %v1709_v52 = vrot.slane %v1708_v0, 4 }
 0x147   : > { %v3000_v22 = vsel %vm737_vm3, %v3864_v56, %v1541_v23  ;;  %v1625_v11 = vsel %vm737_vm3, %v1623_v37, %v1624_v35  ;;  %v3008_v10 = vmul.f32 %v2896_v45, %v2956_v47  ;;  %v3866_v59 = vrot.slane %v2765_v38, 2 }
 0x148   : > { %3865 = vst [vmem:[#allocation41_spill] sm:$0xff] %v3003_v26  ;;  %v1761_v23 = vsel %vm551_vm0, %v1747_v2, 0.0  ;;  %v1633_v56 = vsel %vm551_vm0, %v1624_v35, 0.0  ;;  %v769_v7 = vsel %vm551_vm0, %v752_v3, %v768_v60  ;;  %v1566_v44 = vmul.f32 %v3000_v22, %v2729_v18 }
 0x149   : > { %v1748_v36 = vsel %vm1348_vm4, %v3866_v59, %v1747_v2  ;;  %v1574_v37 = vmul.f32 %v2931_v31, %v3000_v22  ;;  %v1331_v30 = vmul.f32 0.6931472, %v2168_v34  ;;  %v1608_v25 = vadd.f32 %v1607_v8, %v1606_v17 }
 0x14a   : > { %v980_v21 = vand.u32 2147483647, %v2995_v28  ;;  %v3021_v33 = vadd.f32 %v1761_v23, %v1748_v36  ;;  %v3023_v38 = vadd.f32 %v1589_v39, %v1588_v27  ;;  %v1615_v59 = vrot.slane %v1614_v40, 4 }
 0x14b   : > { %v3025_v2 = vadd.f32 %v779_v9, %v775_v41  ;;  %v1710_v35 = vadd.f32 %v1709_v52, %v1708_v0  ;;  %v1700_v3 = vrot.slane %v3003_v26, 4  ;;  %v1634_v60 = vadd.f32 %v1633_v56, %v1625_v11 }
 0x14c   : > { %3867 = vst [vmem:[#allocation42_spill] sm:$0xff] %v3023_v38  ;;  %v1116_v16 = vand.u32 2147483647, %v3008_v10  ;;  %v777_v57 = vadd.f32 %v769_v7, %v2866_v1  ;;  %v1701_v29 = vrot.slane %v1566_v44, 4  ;;  %v781_v34 = vmul.f32 %v2931_v31, %v2737_v50 }
 0x14d   : > { %v1774_v17 = vrot.slane %v1572_v24, 4  ;;  %v1775_v36 = vrot.slane %v1574_v37, 4  ;;  %v3032_v8 = vadd.f32 %v1737_v51, %v1736_v62  ;;  %v1609_v27 = vrot.slane %v1608_v25, 2 }
 0x14e   : > { %v828_v41 = vadd.f32 0.003921569, %v2956_v47  ;;  %v988_v39 = vsub.f32 0.0, %v980_v21  ;;  %v3036_v0 = vadd.f32 %v1331_v30, %v2620_v63  ;;  %v1333_v9 = vmul.f32 0.6931472, %v2170_v48 }
 0x14f   : > { %3868 = vst [vmem:[#allocation43_spill] sm:$0xff] %v3032_v8  ;;  %v1616_v52 = vadd.f32 %v1615_v59, %v1614_v40  ;;  %v1711_v11 = vrot.slane %v1710_v35, 2  ;;  %v3784_v23 = vrot.slane %v3003_v26, 2  ;;  %v1635_v56 = vrot.slane %v1634_v60, 4 }
 0x150   : > { %3869 = vst [vmem:[#allocation44_spill] sm:$0xff] %v3036_v0  ;;  %v1124_v31 = vsub.f32 0.0, %v1116_v16  ;;  %v1702_v24 = vsel %vm737_vm3, %v1700_v3, %v1701_v29  ;;  %v1715_v62 = vsel %vm551_vm0, %v1701_v29, 0.0  ;;  %v785_v51 = vadd.f32 %v781_v34, %v777_v57 }
 0x151   : > { %v1776_v47 = vsel %vm737_vm3, %v1774_v17, %v1775_v36  ;;  %v1610_v21 = vadd.f32 %v1609_v27, %v1608_v25  ;;  %v3044_v63 = vmul.f32 %v2896_v45, %v828_v41  ;;  %v1002_v48 = vmul.f32 1.442695, %v988_v39  ;;  %v3872_v17 = vld [vmem:[#allocation30_spill] sm:$0xff] }
 0x152   : > { %v1789_v40 = vsel %vm551_vm0, %v1775_v36, 0.0  ;;  %v3050_v37 = vadd.f32 %v1333_v9, %v2627_v20  ;;  %v1617_v16 = vrot.slane %v1616_v52, 2  ;;  %v1712_v30 = vadd.f32 %v1711_v11, %v1710_v35  ;;  %v626_v36 = vpop.f32.mrf.mxu0 }
 0x153   : > { %v1138_v59 = vmul.f32 1.442695, %v1124_v31  ;;  %v1716_v29 = vadd.f32 %v1715_v62, %v1702_v24  ;;  %v3052_v57 = vadd.f32 %v1789_v40, %v1776_v47  ;;  %v798_v25 = vsub.f32 0.0, %v2873_v14 }
 0x154   : > { %3870 = vst [vmem:[#allocation45_spill] sm:$0xff] %v3050_v37  ;;  %v3060_v3 = vsel %vm551_vm0, %v3784_v23, 0.0  ;;  %v1636_v34 = vadd.f32 %v1635_v56, %v1634_v60  ;;  %v797_v20 = vsub.f32 %v3872_v17, %v785_v51  ;;  %v1611_v27 = vrot.slane %v1610_v21, 1  ;;  %v3876_v56 = vld [vmem:[#allocation8_spill] sm:$0xff] }
 0x155   : > { %3871 = vst [vmem:[#allocation46_spill] sm:$0xff] %v3060_v3  ;;  %v868_v35 = vand.u32 2147483647, %v3044_v63  ;;  %2171 = vpow2.f32 %v1002_v48  ;;  %v806_v41 = vmul.f32 1.442695, %v798_v25  ;;  %v1713_v24 = vrot.slane %v1712_v30, 1 }
 0x156   : > { %v3069_v62 = vmax.f32 %v2876_v42, -7.0  ;;  %v3071_v47 = vadd.f32 %v1617_v16, %v1616_v52  ;;  %2173 = vpow2.f32 %v1138_v59  ;;  %v1717_v60 = vrot.slane %v1716_v29, 4 }
 0x157   : > { %v627_v51 = vadd.f32 %v626_v36, %v3876_v56  ;;  %v1637_v40 = vrot.slane %v1636_v34, 2  ;;  %v2075_v23 = vadd.f32 -0.003921569, %v797_v20  ;;  %2175 = vpow2.f32 %v806_v41 }
 0x158   : > { %3875 = vst [vmem:[#allocation47_spill] sm:$0xff] %v3069_v62  ;;  %v799_v48 = vsub.f32 0.0, %v3069_v62  ;;  %v876_v25 = vsub.f32 0.0, %v868_v35  ;;  %v826_v31 = vadd.f32 0.003921569, %v2964_v19  ;;  %v1714_v42 = vadd.f32 %v1713_v24, %v1712_v30 }
 0x159   : > { %v3075_v9 = vmax.f32 %v627_v51, -7.0  ;;  %v2072_v44 = vadd.f32 -0.003921569, %v2964_v19  ;;  %v1755_v52 = vrot.slane %v2945_v43, 4  ;;  %v1783_v16 = vrot.slane %v2958_v58, 4 }
 0x15a   : > { %v808_v59 = vmul.f32 1.442695, %v799_v48  ;;  %v1558_v36 = vmul.f32 %v3000_v22, %v2866_v1  ;;  %v1718_v45 = vadd.f32 %v1717_v60, %v1716_v29  ;;  %v3085_v35 = vmul.f32 %v2878_v4, %v826_v31 }
 0x15b   : > { %v800_v41 = vsub.f32 0.0, %v3075_v9  ;;  %v3087_v51 = vadd.f32 %v1611_v27, %v1610_v21  ;;  %v3090_v7 = vmul.f32 %v2900_v15, %v2075_v23  ;;  %v3093_v30 = vmul.f32 %v2878_v4, %v2072_v44 }
 0x15c   : > { %2177 = vpow2.f32 %v808_v59  ;;  %v890_v24 = vmul.f32 1.442695, %v876_v25  ;;  %v829_v48 = vadd.f32 0.003921569, %v797_v20  ;;  %v3097_v1 = vmul.f32 %v2878_v4, %v2964_v19 }
 0x15d   : > { %3877 = vst [vmem:[#allocation8_spill] sm:$0xff] %v3090_v7  ;;  %v810_v39 = vmul.f32 1.442695, %v800_v41  ;;  %v1619_v22 = vrot.slane %v3071_v47, 1  ;;  %v3100_v29 = vadd.f32 %v1637_v40, %v1636_v34  ;;  %v1756_v21 = vadd.f32 %v1755_v52, %v2945_v43 }
 0x15e   : > { %v866_v23 = vand.u32 2147483647, %v3085_v35  ;;  %v1835_v27 = vmul.f32 1.442695, %v1714_v42  ;;  %v1784_v31 = vadd.f32 %v1783_v16, %v2958_v58  ;;  %v1627_v44 = vrot.slane %v1558_v36, 4 }
 0x15f   : > { %v1719_v60 = vrot.slane %v1718_v45, 2  ;;  %v981_v25 = vand.u32 2147483647, %v3090_v7  ;;  %2179 = vpow2.f32 %v810_v39  ;;  %v978_v4 = vand.u32 2147483647, %v3093_v30 }
 0x160   : > { %v874_v59 = vsub.f32 0.0, %v866_v23  ;;  %2181 = vpow2.f32 %v890_v24  ;;  %v3109_v34 = vmul.f32 %v2900_v15, %v829_v48  ;;  %v1114_v43 = vand.u32 2147483647, %v3097_v1 }
 0x161   : > { %v1639_v58 = vrot.slane %v3100_v29, 1  ;;  %v1757_v42 = vrot.slane %v1756_v21, 2  ;;  %v986_v16 = vsub.f32 0.0, %v978_v4  ;;  %2183 = vpow2.f32 %v1835_v27 }
 0x162   : > { %3878 = vst [vmem:[#allocation48_spill] sm:$0xff] %v3109_v34  ;;  %v3112_v40 = vpop.eup %2171  ;;  %v886_v52 = vmul.f32 1.442695, %v874_v59  ;;  %v1785_v39 = vrot.slane %v1784_v31, 2  ;;  %v1720_v36 = vadd.f32 %v1719_v60, %v1718_v45  ;;  %v3116_v41 = vmul.f32 %v2900_v15, %v797_v20  ;;  %v3881_v60 = vld [vmem:[#allocation31_spill] sm:$0xff] }
 0x163   : > { %v2174_v24 = vpop.eup %2173  ;;  %v3880_v23 = vrot.slane %v2949_v53, 4  ;;  %v1641_v19 = vsel %vm551_vm0, %v1627_v44, 0.0  ;;  %v989_v37 = vsub.f32 0.0, %v981_v25  ;;  %v998_v11 = vmul.f32 1.442695, %v986_v16  ;;  %v3882_v53 = vld [vmem:[#allocation25_spill] sm:$0xff] }
 0x164   : > { %3879 = vst [vmem:[#allocation49_spill] sm:$0xff] %v3116_v41  ;;  %v2176_v8 = vpop.eup %2175  ;;  %v3123_v38 = vadd.f32 1.0, %v3112_v40  ;;  %v869_v27 = vand.u32 2147483647, %v3109_v34  ;;  %2185 = vpow2.f32 %v886_v52  ;;  %v1122_v45 = vsub.f32 0.0, %v1114_v43 }
 0x165   : > { %v1628_v48 = vsel %vm737_vm3, %v3880_v23, %v1627_v44  ;;  %v3127_v15 = vmul.f32 %v2176_v8, %v3881_v60  ;;  %v3130_v20 = vmul.f32 %v2176_v8, %v2823_v49  ;;  %v3133_v59 = vmul.f32 %v2176_v8, %v3882_v53 }
 0x166   : > { %2187 = vpow2.f32 %v998_v11  ;;  %v1156_v44 = vadd.f32 1.0, %v2174_v24  ;;  %v1642_v25 = vadd.f32 %v1641_v19, %v1628_v48  ;;  %v1721_v4 = vrot.slane %v1720_v36, 1  ;;  %v3884_v48 = vld [vmem:[#allocation32_spill] sm:$0xff] }
 0x167   : > { %v1117_v16 = vand.u32 2147483647, %v3116_v41  ;;  %v3137_v23 = vadd.f32 %v1619_v22, %v3071_v47  ;;  %v1004_v52 = vmul.f32 1.442695, %v989_v37  ;;  %v862_v43 = vand.u32 2147483647, %v3127_v15 }
 0x168   : > { %v974_v60 = vand.u32 2147483647, %v3130_v20  ;;  %2189 = vrcp.f32 %v3123_v38  ;;  %v1758_v49 = vadd.f32 %v1757_v42, %v1756_v21  ;;  %v877_v8 = vsub.f32 0.0, %v869_v27 }
 0x169   : > { %3883 = vst [vmem:[#allocation31_spill] sm:$0xff] %v3137_v23  ;;  %v2178_v3 = vpop.eup %2177  ;;  %v1134_v53 = vmul.f32 1.442695, %v1122_v45  ;;  %v870_v11 = vsub.f32 0.0, %v862_v43  ;;  %v1110_v19 = vand.u32 2147483647, %v3133_v59  ;;  %2191 = vlog2.f32 %v1156_v44 }
 0x16a   : > { %v982_v24 = vsub.f32 0.0, %v974_v60  ;;  %v3144_v26 = vmul.f32 %v2178_v3, %v3884_v48  ;;  %v1786_v47 = vadd.f32 %v1785_v39, %v1784_v31  ;;  %v1643_v37 = vrot.slane %v1642_v25, 4 }
 0x16b   : > { %v1125_v22 = vsub.f32 0.0, %v1117_v16  ;;  %v1722_v23 = vadd.f32 %v1721_v4, %v1720_v36  ;;  %2193 = vpow2.f32 %v1004_v52  ;;  %v878_v62 = vmul.f32 1.442695, %v870_v11 }
 0x16c   : > { %3885 = vst [vmem:[#allocation25_spill] sm:$0xff] %v3144_v26  ;;  %v990_v7 = vmul.f32 1.442695, %v982_v24  ;;  %v3146_v55 = vpop.eup %2179  ;;  %v1759_v42 = vrot.slane %v1758_v49, 1  ;;  %v863_v27 = vand.u32 2147483647, %v3144_v26  ;;  %2195 = vpow2.f32 %v1134_v53 }
 0x16d   : > { %v3150_v45 = vpop.eup %2181  ;;  %v892_v31 = vmul.f32 1.442695, %v877_v8  ;;  %2197 = vpow2.f32 %v878_v62  ;;  %v1118_v39 = vsub.f32 0.0, %v1110_v19  ;;  %v1787_v36 = vrot.slane %v1786_v47, 1  ;;  %v3886_v62 = vld [vmem:[#allocation34_spill] sm:$0xff] }
 0x16e   : > { %v1644_v4 = vadd.f32 %v1643_v37, %v1642_v25  ;;  %v1140_v16 = vmul.f32 1.442695, %v1125_v22  ;;  %2199 = vpow2.f32 %v990_v7  ;;  %v2184_v52 = vpop.eup %2183  ;;  %v1640_v43 = vadd.f32 %v1639_v58, %v3100_v29  ;;  %v3887_v37 = vld [vmem:[#allocation28_spill] sm:$0xff] }
 0x16f   : > { %v1837_v60 = vmul.f32 1.442695, %v1722_v23  ;;  %v3156_v11 = vmul.f32 %v2178_v3, %v2836_v54  ;;  %v3160_v53 = vmul.f32 %v3146_v55, %v2871_v6  ;;  %v3162_v24 = vadd.f32 %v1759_v42, %v1758_v49 }
 0x170   : > { %v871_v8 = vsub.f32 0.0, %v863_v27  ;;  %v3166_v19 = vmul.f32 %v3146_v55, %v3886_v62  ;;  %v900_v7 = vadd.f32 1.0, %v3150_v45  ;;  %2201 = vpow2.f32 %v892_v31  ;;  %v3889_v62 = vld [vmem:[#allocation17_spill] sm:$0xff] }
 0x171   : > { %v3169_v25 = vpop.eup %2185  ;;  %v1763_v29 = vrot.slane %v3021_v33, 4  ;;  %v1126_v54 = vmul.f32 1.442695, %v1118_v39  ;;  %v864_v58 = vand.u32 2147483647, %v3160_v53  ;;  %v3175_v6 = vadd.f32 %v1787_v36, %v1786_v47 }
 0x172   : > { %v1645_v49 = vrot.slane %v1644_v4, 2  ;;  %2203 = vpow2.f32 %v1140_v16  ;;  %v3178_v48 = vadd.f32 1.0, %v3169_v25  ;;  %v3181_v22 = vmul.f32 %v2178_v3, %v3887_v37  ;;  %v3891_v3 = vld [vmem:[#allocation4_spill] sm:$0xff]  ;;  %v3892_v37 = vld [vmem:[#allocation7_spill] sm:$0xff] }
 0x173   : > { %v3173_v23 = vpop.eup %2187  ;;  %2205 = vpow2.f32 %v1837_v60  ;;  %v975_v42 = vand.u32 2147483647, %v3156_v11  ;;  %v872_v27 = vsub.f32 0.0, %v864_v58  ;;  %v880_v31 = vmul.f32 1.442695, %v871_v8  ;;  %v3895_v8 = vld [vmem:[#allocation33_spill] sm:$0xff] }
 0x174   : > { %3888 = vst [vmem:[#allocation32_spill] sm:$0xff] %v3181_v22  ;;  %2207 = vrcp.f32 %v900_v7  ;;  %v976_v39 = vand.u32 2147483647, %v3166_v19  ;;  %v1561_v47 = vmul.f32 %v3889_v62, %v3075_v9  ;;  %v3188_v16 = vadd.f32 %v1763_v29, %v3021_v33 }
 0x175   : > { %v2190_v36 = vpop.eup %2189  ;;  %2209 = vpow2.f32 %v1126_v54  ;;  %v882_v21 = vmul.f32 1.442695, %v872_v27  ;;  %v3191_v60 = vadd.f32 1.0, %v3173_v23  ;;  %v3893_v44 = vrot.slane %v3891_v3, %v3892_v37 }
 0x176   : > { %3890 = vst [vmem:[#allocation34_spill] sm:$0xff] %v3188_v16  ;;  %2211 = vrcp.f32 %v3178_v48  ;;  %v984_v0 = vsub.f32 0.0, %v976_v39  ;;  %v2192_v61 = vpop.eup %2191  ;;  %v983_v33 = vsub.f32 0.0, %v975_v42  ;;  %v1111_v29 = vand.u32 2147483647, %v3181_v22 }
 0x177   : > { %v1849_v58 = vmul.f32 %v2184_v52, %v3893_v44  ;;  %2213 = vpow2.f32 %v882_v21  ;;  %vm1068_vm5 = vcmp.ge.f32.partialorder %v2995_v28, 0.0  ;;  %v3204_v27 = vadd.f32 %v1645_v49, %v1644_v4 }
 0x178   : > { %v3201_v54 = vpop.eup %2193  ;;  %2215 = vpow2.f32 %v880_v31  ;;  %v994_v44 = vmul.f32 1.442695, %v984_v0  ;;  %v1669_v52 = vrot.slane %v1561_v47, 2  ;;  %v3209_v34 = vmul.f32 %v3146_v55, %v3895_v8  ;;  %v3896_v0 = vld [vmem:[#allocation15_spill] sm:$0xff] }
 0x179   : > { %3894 = vst [vmem:[#allocation28_spill] sm:$0xff] %v3204_v27  ;;  %v2196_v37 = vpop.eup %2195  ;;  %2217 = vrcp.f32 %v3191_v60  ;;  %v1649_v21 = vsel %vm551_vm0, %v1561_v47, 0.0  ;;  %v3215_v62 = vadd.f32 %v1849_v58, %v1640_v43  ;;  %v1076_v4 = vmul.f32 %v2190_v36, %v3112_v40 }
 0x17a   : > { %v3213_v42 = vpop.eup %2197  ;;  %v1559_v49 = vmul.f32 %v3896_v0, %v2873_v14  ;;  %2219 = vpow2.f32 %v994_v44  ;;  %v1171_v39 = vmul.f32 0.6931472, %v2192_v61  ;;  %v992_v8 = vmul.f32 1.442695, %v983_v33 }
 0x17b   : > { %v3220_v31 = vpop.eup %2199  ;;  %v894_v55 = vadd.f32 1.0, %v3213_v42  ;;  %v1119_v18 = vsub.f32 0.0, %v1111_v29  ;;  %2221 = vlog2.f32 %v900_v7  ;;  %v3897_v43 = vrot.slane %v2934_v46, 2 }
 0x17c   : > { %v1006_v41 = vadd.f32 1.0, %v3220_v31  ;;  %v1650_v47 = vadd.f32 %v1649_v21, %v1559_v49  ;;  %v3228_v40 = vadd.f32 1.0, %v3201_v54  ;;  %2223 = vlog2.f32 %v3123_v38 }
 0x17d   : > { %v1671_v58 = vsel %vm1348_vm4, %v1669_v52, %v3897_v43  ;;  %v1112_v44 = vand.u32 2147483647, %v3209_v34  ;;  %v3233_v0 = vpop.eup %2201  ;;  %2225 = vrcp.f32 %v894_v55  ;;  %v1154_v7 = vadd.f32 1.0, %v2196_v37  ;;  %v628_v43 = vpop.f32.mrf.mxu0 }
 0x17e   : > { %3898 = vst [vmem:[#allocation17_spill] sm:$0xff] %v3228_v40  ;;  %v1680_v61 = vadd.f32 %v2983_v5, %v1671_v58  ;;  %v1651_v29 = vrot.slane %v1650_v47, 4  ;;  %2227 = vpow2.f32 %v992_v8  ;;  %v1128_v46 = vmul.f32 1.442695, %v1119_v18 }
 0x17f   : > { %v2204_v21 = vpop.eup %2203  ;;  %v3900_v38 = vmax.f32 %v3008_v10, 0.0  ;;  %2229 = vrcp.f32 %v1006_v41  ;;  %vm956_vm6 = vcmp.ge.f32.partialorder %v3044_v63, 0.0  ;;  %v1084_v37 = vsel %vm1068_vm5, %v2190_v36, %v1076_v4 }
 0x180   : > { %v1681_v49 = vrot.slane %v1680_v61, 4  ;;  %v3237_v22 = vpop.eup %2205  ;;  %v1652_v58 = vadd.f32 %v1651_v29, %v1650_v47  ;;  %2231 = vrcp.f32 %v3228_v40  ;;  %v1120_v18 = vsub.f32 0.0, %v1112_v44 }
 0x181   : > { %3899 = vst [vmem:[#allocation4_spill] sm:$0xff] %v3237_v22  ;;  %v1180_v16 = vadd.f32 %v1171_v39, %v3900_v38  ;;  %v2208_v33 = vpop.eup %2207  ;;  %2233 = vlog2.f32 %v1154_v7  ;;  %v629_v39 = vadd.f32 %v628_v43, %v3876_v56  ;;  %vm954_vm7 = vcmp.ge.f32.partialorder %v3085_v35, 0.0 }
 0x182   : > { %v1682_v8 = vadd.f32 %v1681_v49, %v1680_v61  ;;  %v2210_v52 = vpop.eup %2209  ;;  %v1653_v27 = vrot.slane %v1652_v58, 2  ;;  %2235 = vpow2.f32 %v1128_v46  ;;  %v964_v4 = vmul.f32 %v2208_v33, %v3150_v45 }
 0x183   : > { %v2212_v38 = vpop.eup %2211  ;;  %v1196_v36 = vmul.f32 2.0, %v1180_v16  ;;  %2237 = vlog2.f32 %v3178_v48  ;;  %v1130_v56 = vmul.f32 1.442695, %v1120_v18  ;;  %v1150_v43 = vadd.f32 1.0, %v2210_v52 }
 0x184   : > { %v1683_v29 = vrot.slane %v1682_v8, 2  ;;  %v3250_v5 = vpop.eup %2213  ;;  %v1654_v44 = vadd.f32 %v1653_v27, %v1652_v58  ;;  %2239 = vlog2.f32 %v3191_v60  ;;  %v3260_v22 = vmax.f32 %v629_v39, -7.0 }
 0x185   : > { %v3254_v61 = vpop.eup %2215  ;;  %v3257_v7 = vadd.f32 1.0, %v3250_v5  ;;  %2241 = vlog2.f32 %v894_v55  ;;  %v962_v45 = vmul.f32 %v2212_v38, %v3169_v25  ;;  %vm1066_vm8 = vcmp.ge.f32.partialorder %v3093_v30, 0.0 }
 0x186   : > { %v1684_v46 = vadd.f32 %v1683_v29, %v1682_v8  ;;  %v2218_v49 = vpop.eup %2217  ;;  %v1655_v47 = vrot.slane %v1654_v44, 1  ;;  %3901 = vst [vmem:[#allocation7_spill] sm:$0xff] %v3260_v22  ;;  %2243 = vlog2.f32 %v1006_v41  ;;  %v3902_v58 = vsub.f32 %v3008_v10, %v2727_v32 }
 0x187   : > { %v3262_v16 = vpop.eup %2219  ;;  %2245 = vrcp.f32 %v3257_v7  ;;  %v1074_v27 = vmul.f32 %v2218_v49, %v3173_v23  ;;  %v1157_v8 = vadd.f32 1.0, %v2204_v21  ;;  %v3275_v39 = vadd.f32 1.0, %v3254_v61 }
 0x188   : > { %v1685_v48 = vrot.slane %v1684_v46, 1  ;;  %v3268_v60 = vadd.f32 1.0, %v3262_v16  ;;  %v1656_v55 = vadd.f32 %v1655_v47, %v1654_v44  ;;  %v2222_v52 = vpop.eup %2221  ;;  %v1204_v18 = vsub.f32 %v3902_v58, %v1196_v36 }
 0x189   : > { %2247 = vpow2.f32 %v1130_v56  ;;  %v2224_v25 = vpop.eup %2223  ;;  %v972_v29 = vsel %vm956_vm6, %v2208_v33, %v964_v4  ;;  %v801_v40 = vsub.f32 0.0, %v3260_v22  ;;  %v3284_v32 = vsel %vm737_vm3, %v2737_v50, %v3872_v17 }
 0x18a   : > { %v1686_v41 = vadd.f32 %v1685_v48, %v1684_v46  ;;  %2249 = vlog2.f32 %v1150_v43  ;;  %v2226_v23 = vpop.eup %2225  ;;  %v1798_v47 = vmul.f32 1.442695, %v1656_v55  ;;  %3903 = vst [vmem:[#allocation33_spill] sm:$0xff] %v3284_v32  ;;  %v789_v10 = vsel %vm737_vm3, %v2990_v12, %v3025_v2 }
 0x18b   : > { %2251 = vrcp.f32 %v3268_v60  ;;  %v3289_v21 = vpop.eup %2227  ;;  %v958_v36 = vmul.f32 %v2226_v23, %v3213_v42  ;;  %v970_v33 = vsel %vm954_vm7, %v2212_v38, %v962_v45  ;;  %v1082_v4 = vsel %vm1066_vm8, %v2218_v49, %v1074_v27 }
 0x18c   : > { %v1817_v44 = vmul.f32 1.442695, %v1686_v41  ;;  %v2230_v56 = vpop.eup %2229  ;;  %2253 = vlog2.f32 %v1157_v8  ;;  %vm950_vm9 = vcmp.ge.f32.partialorder %v3127_v15, 0.0  ;;  %vm1062_vm10 = vcmp.ge.f32.partialorder %v3130_v20, 0.0 }
 0x18d   : > { %v3298_v50 = vsub.f32 %v972_v29, %v1084_v37  ;;  %v3300_v12 = vpop.eup %2231  ;;  %v966_v2 = vsel %vm950_vm9, %v2226_v23, %v958_v36  ;;  %v1070_v42 = vmul.f32 %v2230_v56, %v3220_v31  ;;  %2255 = vrcp.f32 %v3275_v39 }
 0x18e   : > { %v812_v38 = vmul.f32 1.442695, %v801_v40  ;;  %v2234_v46 = vpop.eup %2233  ;;  %v3305_v49 = vadd.f32 1.0, %v3289_v21  ;;  %v3307_v43 = vsub.f32 %v970_v33, %v1082_v4  ;;  %2257 = vpow2.f32 %v1798_v47 }
 0x18f   : > { %v3310_v45 = vsub.f32 %v3284_v32, %v789_v10  ;;  %v2236_v37 = vpop.eup %2235  ;;  %v1078_v48 = vsel %vm1062_vm10, %v2230_v56, %v1070_v42  ;;  %v915_v27 = vmul.f32 0.6931472, %v2222_v52  ;;  %2259 = vpow2.f32 %v1817_v44 }
 0x190   : > { %3904 = vst [vmem:[#allocation15_spill] sm:$0xff] %v3305_v49  ;;  %v2238_v31 = vpop.eup %2237  ;;  %v3314_v58 = vadd.f32 -4.8481164, %v1204_v18  ;;  %v918_v40 = vmax.f32 %v3127_v15, 0.0  ;;  %v1030_v8 = vmax.f32 %v3130_v20, 0.0  ;;  %v3318_v41 = vsub.f32 %v966_v2, %v1078_v48 }
 0x191   : > { %v2240_v29 = vpop.eup %2239  ;;  %v1142_v23 = vmax.f32 %v3133_v59, 0.0  ;;  %v1167_v47 = vmul.f32 0.6931472, %v2234_v46  ;;  %v1220_v10 = vmax.f32 %v3298_v50, 1e-12  ;;  %2261 = vpow2.f32 %v812_v38  ;;  %v3907_v38 = vld [vmem:[#allocation36_spill] sm:$0xff] }
 0x192   : > { %v2242_v52 = vpop.eup %2241  ;;  %2263 = vrcp.f32 %v3305_v49  ;;  %v1218_v18 = vmax.f32 %v3307_v43, 1e-12  ;;  %v827_v33 = vadd.f32 0.003921569, %v3310_v45  ;;  %v1214_v4 = vmax.f32 %v3318_v41, 1e-12 }
 0x193   : > { %v2244_v20 = vpop.eup %2243  ;;  %2265 = vlog2.f32 %v3257_v7  ;;  %v3905_v44 = vmax.f32 %v3044_v63, 0.0  ;;  %v1027_v2 = vmul.f32 0.6931472, %v2224_v25  ;;  %vm952_vm11 = vcmp.ge.f32.partialorder %v3160_v53, 0.0 }
 0x194   : > { %v2246_v42 = vpop.eup %2245  ;;  %2267 = vlog2.f32 %v3268_v60  ;;  %vm1064_vm12 = vcmp.ge.f32.partialorder %v3166_v19, 0.0  ;;  %v3906_v7 = vmax.f32 %v3097_v1, 0.0  ;;  %v911_v25 = vmul.f32 0.6931472, %v2238_v31 }
 0x195   : > { %v3331_v56 = vadd.f32 %v3905_v44, %v915_v27  ;;  %v960_v36 = vmul.f32 %v2246_v42, %v3250_v5  ;;  %2269 = vlog2.f32 %v1220_v10  ;;  %v3342_v32 = vmul.f32 %v3907_v38, %v827_v33 }
 0x196   : > { %v2248_v48 = vpop.eup %2247  ;;  %v1178_v55 = vadd.f32 %v1167_v47, %v3906_v7  ;;  %2271 = vlog2.f32 %v1218_v18  ;;  %v1151_v60 = vadd.f32 1.0, %v2236_v37  ;;  %v3909_v46 = vmax.f32 %v2995_v28, 0.0 }
 0x197   : > { %v2250_v27 = vpop.eup %2249  ;;  %v1152_v44 = vadd.f32 1.0, %v2248_v48  ;;  %3908 = vst [vmem:[#allocation36_spill] sm:$0xff] %v3342_v32  ;;  %2273 = vlog2.f32 %v1214_v4  ;;  %v903_v49 = vmul.f32 0.6931472, %v2242_v52  ;;  %v968_v47 = vsel %vm952_vm11, %v2246_v42, %v960_v36 }
 0x198   : > { %v2252_v17 = vpop.eup %2251  ;;  %v3346_v22 = vadd.f32 %v3909_v46, %v1027_v2  ;;  %v1023_v31 = vmul.f32 0.6931472, %v2240_v29  ;;  %v1015_v33 = vmul.f32 0.6931472, %v2244_v20  ;;  %v1159_v48 = vmul.f32 0.6931472, %v2250_v27 }
 0x199   : > { %v1072_v10 = vmul.f32 %v2252_v17, %v3262_v16  ;;  %v3353_v18 = vpop.eup %2253  ;;  %2275 = vlog2.f32 %v1152_v44  ;;  %v1194_v37 = vmul.f32 2.0, %v1178_v55  ;;  %vm951_vm13 = vcmp.ge.f32.partialorder %v3144_v26, 0.0  ;;  %v3913_v44 = vld [vmem:[#allocation14_spill] sm:$0xff] }
 0x19a   : > { %3910 = vst [vmem:[#allocation50_spill] sm:$0xff] %v3353_v18  ;;  %v2256_v4 = vpop.eup %2255  ;;  %v3911_v28 = vmax.f32 %v3085_v35, 0.0  ;;  %v867_v16 = vand.u32 2147483647, %v3342_v32  ;;  %v3370_v46 = vadd.f32 1.0, %v3233_v0  ;;  %v3372_v27 = vadd.f32 %v918_v40, %v903_v49  ;;  %v3916_v40 = vld [vmem:[#allocation39_spill] sm:$0xff] }
 0x19b   : > { %v1080_v52 = vsel %vm1064_vm12, %v2252_v17, %v1072_v10  ;;  %v2258_v36 = vpop.eup %2257  ;;  %2277 = vlog2.f32 %v1151_v60  ;;  %v3912_v17 = vmax.f32 %v3093_v30, 0.0  ;;  %v3914_v10 = vrot.slane %v3891_v3, %v3913_v44  ;;  %v3924_v30 = vld [vmem:[#allocation29_spill] sm:$0xff] }
 0x19c   : > { %v3358_v2 = vadd.f32 %v3911_v28, %v911_v25  ;;  %v3365_v42 = vsub.f32 %v968_v47, %v1080_v52  ;;  %v2260_v7 = vpop.eup %2259  ;;  %v3381_v47 = vadd.f32 %v1030_v8, %v1015_v33  ;;  %v1174_v52 = vadd.f32 %v1159_v48, %v1142_v23 }
 0x19d   : > { %v3376_v25 = vadd.f32 %v3912_v17, %v1023_v31  ;;  %v1813_v28 = vmul.f32 %v2258_v36, %v3914_v10  ;;  %v3915_v5 = vsub.f32 %v3097_v1, %v2709_v13  ;;  %v3917_v31 = vld [vmem:[#allocation16_spill] sm:$0xff]  ;;  %v875_v8 = vsub.f32 0.0, %v867_v16  ;;  %v3919_v13 = vld [vmem:[#allocation37_spill] sm:$0xff] }
 0x19e   : > { %v1216_v55 = vmax.f32 %v3365_v42, 1e-12  ;;  %v3387_v49 = vpop.eup %2261  ;;  %v3918_v17 = vrot.slane %v3891_v3, %v3917_v31  ;;  %v959_v23 = vmul.f32 %v2256_v4, %v3254_v61  ;;  %vm1889_vm14 = vcmask 1040384   ;;  %v3921_v31 = vld [vmem:[#allocation23_spill] sm:$0xff] }
 0x19f   : > { %v1202_v20 = vsub.f32 %v3915_v5, %v1194_v37  ;;  %v1815_v60 = vadd.f32 %v1813_v28, %v3916_v40  ;;  %v3395_v33 = vpop.eup %2263  ;;  %v3400_v1 = vmul.f32 %v3387_v49, %v3919_v13  ;;  %v2073_v5 = vadd.f32 -0.003921569, %v3310_v45 }
 0x1a0   : > { %v1831_v36 = vmul.f32 %v2260_v7, %v3918_v17  ;;  %2279 = vlog2.f32 %v1216_v55  ;;  %v2266_v48 = vpop.eup %2265  ;;  %v1190_v55 = vmul.f32 2.0, %v1174_v52  ;;  %vm1210_vm15 = vcmp.gt.f32.partialorder %v3307_v43, 1e-05  ;;  %v3922_v17 = vld [vmem:[#allocation40_spill] sm:$0xff] }
 0x1a1   : > { %3920 = vst [vmem:[#allocation14_spill] sm:$0xff] %v3400_v1  ;;  %v2088_v7 = vclamps-f32 %v1815_v60, 1.0  ;;  %v2268_v44 = vpop.eup %2267  ;;  %vm1212_vm1 = vcmp.gt.f32.partialorder %v3298_v50, 1e-05  ;;  %v2080_v10 = vadd.f32 -4.8481164, %v1202_v20  ;;  %v3422_v20 = vsel %vm951_vm13, %v2256_v4, %v959_v23 }
 0x1a2   : > { %v1833_v16 = vadd.f32 %v1831_v36, %v3087_v51  ;;  %v865_v28 = vand.u32 2147483647, %v3400_v1  ;;  %v2270_v40 = vpop.eup %2269  ;;  %vm1260_vm2 = vcmp.gt.f32.partialorder %v3921_v31, 0.999  ;;  %v3923_v51 = vld [vmem:[#allocation38_spill] sm:$0xff]  ;;  %v3425_v61 = vmul.f32 %v3907_v38, %v2073_v5 }
 0x1a3   : > { %v1857_v13 = vmul.f32 %v2088_v7, %v3922_v17  ;;  %v1865_v37 = vmul.f32 %v2088_v7, %v3162_v24  ;;  %v3416_v60 = vmul.f32 %v3387_v49, %v3923_v51  ;;  %v888_v36 = vmul.f32 1.442695, %v875_v8  ;;  %v2272_v52 = vpop.eup %2271  ;;  %v3925_v24 = vld [vmem:[#allocation20_spill] sm:$0xff] }
 0x1a4   : > { %vm1258_vm5 = vcmp.gt.f32.partialorder %v3924_v30, 0.999  ;;  %vm1206_vm6 = vcmp.gt.f32.partialorder %v3318_v41, 1e-05  ;;  %v873_v17 = vsub.f32 0.0, %v865_v28  ;;  %v2274_v3 = vpop.eup %2273  ;;  %v1071_v51 = vmul.f32 %v3395_v33, %v3289_v21 }
 0x1a5   : > { %vm1254_vm7 = vcmp.gt.f32.partialorder %v3925_v24, 0.999  ;;  %v907_v8 = vmul.f32 0.6931472, %v2266_v48  ;;  %v1859_v29 = vadd.f32 %v1857_v13, %v1833_v16  ;;  %v1867_v32 = vadd.f32 %v1865_v37, %v3215_v62  ;;  %v3927_v62 = vld [vmem:[#allocation26_spill] sm:$0xff] }
 0x1a6   : > { %v3926_v1 = vsub.f32 %v3133_v59, %v2873_v14  ;;  %vm1063_vm8 = vcmp.ge.f32.partialorder %v3156_v11, 0.0  ;;  %v1019_v4 = vmul.f32 0.6931472, %v2268_v44  ;;  %v1235_v23 = vmul.f32 0.6931472, %v2270_v40  ;;  %v2276_v28 = vpop.eup %2275 }
 0x1a7   : > { %vm1276_vm9 = vcmp.lt.f32.partialorder %v3921_v31, -0.999  ;;  %v884_v5 = vmul.f32 1.442695, %v873_v17  ;;  %v1231_v18 = vmul.f32 0.6931472, %v2272_v52  ;;  %2281 = vpow2.f32 %v888_v36 }
 0x1a8   : > { %v1198_v26 = vsub.f32 %v3926_v1, %v1190_v55  ;;  %vm1274_vm10 = vcmp.lt.f32.partialorder %v3924_v30, -0.999  ;;  %v2090_v21 = vclamps-f32 %v1859_v29, 1.0  ;;  %v977_v48 = vand.u32 2147483647, %v3416_v60  ;;  %v3444_v44 = vpop.eup %2277 }
 0x1a9   : > { %vm1256_vm11 = vcmp.gt.f32.partialorder %v3927_v62, 0.999  ;;  %v1223_v37 = vmul.f32 0.6931472, %v2274_v3  ;;  %vm1270_vm12 = vcmp.lt.f32.partialorder %v3925_v24, -0.999  ;;  %2283 = vpow2.f32 %v884_v5 }
 0x1aa   : > { %v1163_v14 = vmul.f32 0.6931472, %v2276_v28  ;;  %v979_v59 = vand.u32 2147483647, %v3425_v61  ;;  %vm1272_vm13 = vcmp.lt.f32.partialorder %v3927_v62, -0.999  ;;  %v1869_v1 = vmul.f32 %v2090_v21, %v3175_v6 }
 0x1ab   : > { %v1879_v16 = vrot.slane %v2090_v21, 7  ;;  %2285 = vrcp.f32 %v3370_v46  ;;  %v985_v29 = vsub.f32 0.0, %v977_v48  ;;  %v2076_v55 = vadd.f32 -4.8481164, %v1198_v26  ;;  %v3929_v26 = vld [vmem:[#allocation35_spill] sm:$0xff] }
 0x1ac   : > { %v3928_v40 = vmax.f32 %v3209_v34, 0.0  ;;  %v3450_v13 = vmul.f32 %v3907_v38, %v3310_v45  ;;  %v987_v36 = vsub.f32 0.0, %v979_v59  ;;  %v1250_v52 = vsel %vm1210_vm15, %v1231_v18, %v2080_v10  ;;  %v3941_v24 = vld [vmem:[#allocation11_spill] sm:$0xff] }
 0x1ad   : > { %v1252_v6 = vsel %vm1212_vm1, %v1235_v23, %v3314_v58  ;;  %v1871_v17 = vadd.f32 %v1869_v1, %v1867_v32  ;;  %v1890_v5 = vsel %vm1889_vm14, %v2088_v7, %v1879_v16  ;;  %v3460_v21 = vmul.f32 %v3387_v49, %v3929_v26  ;;  %v2280_v45 = vpop.eup %2279 }
 0x1ae   : > { %v1176_v3 = vadd.f32 %v1163_v14, %v3928_v40  ;;  %v996_v48 = vmul.f32 1.442695, %v985_v29  ;;  %v1000_v14 = vmul.f32 1.442695, %v987_v36  ;;  %v1246_v38 = vsel %vm1206_vm6, %v1223_v37, %v2076_v55 }
 0x1af   : > { %v3930_v43 = vmax.f32 %v3160_v53, 0.0  ;;  %v3931_v50 = vmax.f32 %v3166_v19, 0.0  ;;  %v2092_v32 = vclamps-f32 %v1871_v17, 1.0  ;;  %v3932_v7 = vsub.f32 %v3209_v34, %v3075_v9 }
 0x1b0   : > { %v1192_v28 = vmul.f32 2.0, %v1176_v3  ;;  %v1227_v23 = vmul.f32 0.6931472, %v2280_v45  ;;  %v3933_v49 = vsub.f32 0.0, %v3346_v22  ;;  %2287 = vpow2.f32 %v996_v48 }
 0x1b1   : > { %v928_v18 = vadd.f32 %v3930_v43, %v907_v8  ;;  %v1040_v58 = vadd.f32 %v3931_v50, %v1019_v4  ;;  %v1079_v41 = vsel %vm1063_vm8, %v3395_v33, %v1071_v51  ;;  %v3934_v8 = vsub.f32 0.0, %v3376_v25 }
 0x1b2   : > { %v1200_v10 = vsub.f32 %v3932_v7, %v1192_v28  ;;  %v1268_v59 = vsel %vm1260_vm2, %v3933_v49, %v1252_v6  ;;  %v1885_v4 = vrot.slane %v2092_v32, 6  ;;  %2289 = vpow2.f32 %v1000_v14  ;;  %v3944_v14 = vld [vmem:[#allocation9_spill] sm:$0xff]  ;;  %v3946_v32 = vld [vmem:[#allocation15_spill] sm:$0xff] }
 0x1b3   : > { %v1266_v19 = vsel %vm1258_vm5, %v3934_v8, %v1250_v52  ;;  %v3935_v9 = vsub.f32 0.0, %v3381_v47  ;;  %v1113_v37 = vand.u32 2147483647, %v3460_v21  ;;  %v1115_v1 = vand.u32 2147483647, %v3450_v13  ;;  %v3942_v52 = vld [vmem:[#allocation44_spill] sm:$0xff] }
 0x1b4   : > { %v2078_v22 = vadd.f32 -4.8481164, %v1200_v10  ;;  %v1096_v16 = vsub.f32 0.0, %v1040_v58  ;;  %vm1208_vm15 = vcmp.gt.f32.partialorder %v3365_v42, 1e-05  ;;  %v3936_v25 = vsub.f32 %v3044_v63, %v3331_v56 }
 0x1b5   : > { %v1262_v34 = vsel %vm1254_vm7, %v3935_v9, %v1246_v38  ;;  %v3495_v51 = vsel %vm551_vm0, %v1890_v5, %v1885_v4  ;;  %v1088_v47 = vsub.f32 %v3160_v53, %v928_v18  ;;  %v3937_v55 = vsub.f32 %v3085_v35, %v3358_v2  ;;  %v3515_v35 = vpop.eup %2281  ;;  %v3940_v2 = vld [vmem:[#allocation48_spill] sm:$0xff] }
 0x1b6   : > { %v1284_v33 = vsel %vm1276_vm9, %v3936_v25, %v1268_v59  ;;  %v1248_v29 = vsel %vm1208_vm15, %v1227_v23, %v2078_v22  ;;  %v1121_v3 = vsub.f32 0.0, %v1113_v37  ;;  %v3938_v42 = vrot.slane %v3052_v57, 4  ;;  %v3950_v22 = vld [vmem:[#allocation8_spill] sm:$0xff] }
 0x1b7   : > { %v1282_v40 = vsel %vm1274_vm10, %v3937_v55, %v1266_v19  ;;  %v3939_v56 = vsub.f32 %v3127_v15, %v3372_v27  ;;  %v1264_v53 = vsel %vm1256_vm11, %v1096_v16, %v1248_v29  ;;  %v1123_v36 = vsub.f32 0.0, %v1115_v1  ;;  %v3524_v27 = vpop.eup %2283  ;;  %v3948_v19 = vld [vmem:[#allocation34_spill] sm:$0xff] }
 0x1b8   : > { %v3506_v63 = vadd.f32 %v3938_v42, %v3052_v57  ;;  %vm957_vm1 = vcmp.ge.f32.partialorder %v3940_v2, 0.0  ;;  %2291 = vlog2.f32 %v3275_v39  ;;  %v3520_v30 = vsub.f32 %v3422_v20, %v1079_v41  ;;  %v2286_v48 = vpop.eup %2285  ;;  %v3947_v41 = vld [vmem:[#allocation28_spill] sm:$0xff] }
 0x1b9   : > { %v1278_v31 = vsel %vm1270_vm12, %v3939_v56, %v1262_v34  ;;  %v1280_v57 = vsel %vm1272_vm13, %v1088_v47, %v1264_v53  ;;  %v1366_v15 = vrot.slane %v1284_v33, 4  ;;  %v3943_v6 = vsub.f32 %v3941_v24, %v3942_v52  ;;  %v3954_v53 = vld [vmem:[#allocation18_spill] sm:$0xff] }
 0x1ba   : > { %v1349_v5 = vrot.slane %v1280_v57, 2  ;;  %v1350_v28 = vrot.slane %v1282_v40, 2  ;;  %v1132_v26 = vmul.f32 1.442695, %v1121_v3  ;;  %v3945_v39 = vsub.f32 %v3944_v14, %v3942_v52  ;;  %v3952_v3 = vld [vmem:[#allocation24_spill] sm:$0xff] }
 0x1bb   : > { %v1342_v17 = vadd.f32 %v3943_v6, %v1280_v57  ;;  %v1365_v20 = vrot.slane %v1282_v40, 4  ;;  %v3533_v38 = vadd.f32 1.0, %v3524_v27  ;;  %v1136_v62 = vmul.f32 1.442695, %v1123_v36  ;;  %v3951_v40 = vld [vmem:[#allocation7_spill] sm:$0xff] }
 0x1bc   : > { %v1340_v45 = vadd.f32 %v3945_v39, %v1278_v31  ;;  %v1351_v43 = vsel %vm1348_vm4, %v1349_v5, %v1350_v28  ;;  %v899_v50 = vadd.f32 1.0, %v3515_v35  ;;  %2293 = vpow2.f32 %v1132_v26  ;;  %v3953_v31 = vld [vmem:[#allocation47_spill] sm:$0xff]  ;;  %v3956_v39 = vld [vmem:[#allocation32_spill] sm:$0xff] }
 0x1bd   : > { %v1361_v18 = vadd.f32 %v1350_v28, %v1342_v17  ;;  %v1077_v58 = vmul.f32 %v3300_v12, %v3201_v54  ;;  %2295 = vlog2.f32 %v3946_v32  ;;  %v1215_v7 = vmax.f32 %v3520_v30, 1e-12  ;;  %v3554_v34 = vpop.eup %2287 }
 0x1be   : > { %v1359_v10 = vadd.f32 %v1351_v43, %v1340_v45  ;;  %v1367_v23 = vsel %vm737_vm3, %v1365_v20, %v1366_v15  ;;  %2297 = vrcp.f32 %v3533_v38  ;;  %v965_v59 = vmul.f32 %v2286_v48, %v3233_v0  ;;  %v3957_v20 = vld [vmem:[#allocation41_spill] sm:$0xff] }
 0x1bf   : > { %v3542_v49 = vadd.f32 %v1366_v15, %v1361_v18  ;;  %v1647_v8 = vrot.slane %v3947_v41, 1  ;;  %v3949_v4 = vrot.slane %v3948_v19, 2  ;;  %2299 = vpow2.f32 %v1136_v62  ;;  %v3560_v0 = vpop.eup %2289  ;;  %v3955_v15 = vld [vmem:[#allocation50_spill] sm:$0xff] }
 0x1c0   : > { %v3552_v54 = vadd.f32 %v1367_v23, %v1359_v10  ;;  %v1037_v37 = vmax.f32 %v3950_v22, 0.0  ;;  %vm1069_vm2 = vcmp.ge.f32.partialorder %v3950_v22, 0.0  ;;  %2301 = vrcp.f32 %v899_v50  ;;  %v3961_v10 = vld [vmem:[#allocation4_spill] sm:$0xff]  ;;  %v3973_v22 = vld [vmem:[#allocation30_spill] sm:$0xff] }
 0x1c1   : > { %v3550_v9 = vadd.f32 %v3949_v4, %v3948_v19  ;;  %v1379_v1 = vsel %vm551_vm0, %v3542_v49, -inf  ;;  %v1085_v16 = vsel %vm1069_vm2, %v3300_v12, %v1077_v58  ;;  %v1793_v25 = vrot.slane %v3506_v63, 2  ;;  %v3959_v58 = vld [vmem:[#allocation46_spill] sm:$0xff]  ;;  %v3964_v19 = vld [vmem:[#allocation17_spill] sm:$0xff] }
 0x1c2   : > { %v1380_v33 = vmax.f32 %v3552_v54, %v1379_v1  ;;  %v1009_v47 = vadd.f32 1.0, %v3554_v34  ;;  %2303 = vlog2.f32 %v1215_v7  ;;  %v973_v29 = vsel %vm957_vm1, %v2286_v48, %v965_v59  ;;  %v3960_v7 = vld [vmem:[#allocation10_spill] sm:$0xff] }
 0x1c3   : > { %v3569_v55 = vadd.f32 1.0, %v3560_v0  ;;  %v1562_v42 = vmul.f32 %v3952_v3, %v3951_v40  ;;  %v3574_v56 = vadd.f32 %v1647_v8, %v3947_v41  ;;  %v1767_v12 = vrot.slane %v3550_v9, 1 }
 0x1c4   : > { %v1560_v36 = vmul.f32 %v3954_v53, %v3953_v31  ;;  %v1381_v57 = vrot.slane %v1380_v33, 4  ;;  %v1173_v24 = vmul.f32 0.6931472, %v3955_v15  ;;  %v1161_v52 = vmul.f32 0.6931472, %v3444_v44 }
 0x1c5   : > { %v1657_v6 = vsel %vm551_vm0, %v1562_v42, 0.0  ;;  %v1672_v17 = vrot.slane %v1562_v42, 2  ;;  %2305 = vrcp.f32 %v1009_v47  ;;  %v3582_v28 = vsub.f32 %v973_v29, %v1085_v16  ;;  %v2292_v48 = vpop.eup %2291  ;;  %v3965_v29 = vld [vmem:[#allocation25_spill] sm:$0xff] }
 0x1c6   : > { %v1382_v5 = vmax.f32 %v1380_v33, %v1381_v57  ;;  %v1658_v26 = vadd.f32 %v1657_v6, %v1560_v36  ;;  %v3585_v14 = vadd.f32 %v1793_v25, %v3506_v63  ;;  %v1143_v45 = vmax.f32 %v3956_v39, 0.0  ;;  %v3962_v63 = vld [vmem:[#allocation49_spill] sm:$0xff] }
 0x1c7   : > { %2307 = vrcp.f32 %v3569_v55  ;;  %v3958_v62 = vrot.slane %v3957_v20, 2  ;;  %v3596_v23 = vmul.f32 %v3961_v10, %v3960_v7  ;;  %v3963_v59 = vmax.f32 %v3962_v63, 0.0 }
 0x1c8   : > { %v1383_v43 = vrot.slane %v1382_v5, 2  ;;  %2309 = vlog2.f32 %v3370_v46  ;;  %v1659_v18 = vrot.slane %v1658_v26, 4  ;;  %v1175_v8 = vadd.f32 %v1161_v52, %v1143_v45 }
 0x1c9   : > { %v1674_v44 = vsel %vm1348_vm4, %v1672_v17, %v3958_v62  ;;  %v1181_v41 = vadd.f32 %v1173_v24, %v3963_v59  ;;  %2311 = vlog2.f32 %v3964_v19  ;;  %v2294_v4 = vpop.eup %2293  ;;  %v1221_v16 = vmax.f32 %v3582_v28, 1e-12  ;;  %v3967_v59 = vld [vmem:[#allocation14_spill] sm:$0xff] }
 0x1ca   : > { %v1688_v32 = vadd.f32 %v3959_v58, %v1674_v44  ;;  %v1384_v1 = vmax.f32 %v1382_v5, %v1383_v43  ;;  %v1660_v25 = vadd.f32 %v1659_v18, %v1658_v26  ;;  %v2296_v46 = vpop.eup %2295  ;;  %v919_v3 = vmax.f32 %v3965_v29, 0.0  ;;  %v3966_v58 = vld [vmem:[#allocation21_spill] sm:$0xff] }
 0x1cb   : > { %v1031_v42 = vmax.f32 %v3156_v11, 0.0  ;;  %2313 = vlog2.f32 %v899_v50  ;;  %v1153_v53 = vadd.f32 1.0, %v2294_v4  ;;  %v2298_v36 = vpop.eup %2297  ;;  %v1183_v57 = vsub.f32 %v3956_v39, %v3953_v31 }
 0x1cc   : > { %v1689_v33 = vrot.slane %v1688_v32, 4  ;;  %v1385_v15 = vrot.slane %v1384_v1, 1  ;;  %2315 = vlog2.f32 %v3533_v38  ;;  %v1661_v24 = vrot.slane %v1660_v25, 2  ;;  %v2300_v52 = vpop.eup %2299 }
 0x1cd   : > { %v1197_v6 = vmul.f32 2.0, %v1181_v41  ;;  %v1191_v17 = vmul.f32 2.0, %v1175_v8  ;;  %2317 = vlog2.f32 %v1153_v53  ;;  %v2302_v26 = vpop.eup %2301  ;;  %v1155_v20 = vadd.f32 1.0, %v2300_v52  ;;  %v3968_v41 = vld [vmem:[#allocation36_spill] sm:$0xff] }
 0x1ce   : > { %v1690_v5 = vadd.f32 %v1689_v33, %v1688_v32  ;;  %v3607_v45 = vmax.f32 %v1384_v1, %v1385_v15  ;;  %2319 = vlog2.f32 %v1221_v16  ;;  %v1662_v11 = vadd.f32 %v1661_v24, %v1660_v25 }
 0x1cf   : > { %v905_v50 = vmul.f32 0.6931472, %v2292_v48  ;;  %v1017_v62 = vmul.f32 0.6931472, %v2296_v46  ;;  %2321 = vlog2.f32 %v1009_v47  ;;  %v2304_v31 = vpop.eup %2303  ;;  %v961_v43 = vmul.f32 %v2298_v36, %v3524_v27 }
 0x1d0   : > { %v1691_v44 = vrot.slane %v1690_v5, 2  ;;  %v1395_v38 = vsub.f32 %v3552_v54, %v3607_v45  ;;  %v1397_v39 = vsub.f32 %v3542_v49, %v3607_v45  ;;  %2323 = vlog2.f32 %v1155_v20 }
 0x1d1   : > { %v1199_v18 = vsub.f32 %v1183_v57, %v1191_v17  ;;  %vm1255_vm5 = vcmp.gt.f32.partialorder %v3966_v58, 0.999  ;;  %v963_v32 = vmul.f32 %v2302_v26, %v3515_v35  ;;  %v1663_v7 = vrot.slane %v1662_v11, 1 }
 0x1d2   : > { %v1692_v48 = vadd.f32 %v1691_v44, %v1690_v5  ;;  %v1399_v10 = vmul.f32 1.442695, %v1395_v38  ;;  %v1403_v47 = vmul.f32 1.442695, %v1397_v39  ;;  %vm953_vm6 = vcmp.ge.f32.partialorder %v3967_v59, 0.0  ;;  %v2306_v54 = vpop.eup %2305 }
 0x1d3   : > { %vm955_vm7 = vcmp.ge.f32.partialorder %v3968_v41, 0.0  ;;  %v1225_v8 = vmul.f32 0.6931472, %v2304_v31  ;;  %2325 = vlog2.f32 %v3569_v55  ;;  %v1664_v49 = vadd.f32 %v1663_v7, %v1662_v11 }
 0x1d4   : > { %v1693_v27 = vrot.slane %v1692_v48, 1  ;;  %v2308_v19 = vpop.eup %2307  ;;  %vm1271_vm8 = vcmp.lt.f32.partialorder %v3966_v58, -0.999  ;;  %2327 = vpow2.f32 %v1399_v10  ;;  %v969_v4 = vsel %vm953_vm6, %v2298_v36, %v961_v43 }
 0x1d5   : > { %vm1065_vm9 = vcmp.ge.f32.partialorder %v3416_v60, 0.0  ;;  %v1073_v35 = vmul.f32 %v2306_v54, %v3554_v34  ;;  %v2310_v1 = vpop.eup %2309  ;;  %2329 = vpow2.f32 %v1403_v47  ;;  %v971_v16 = vsel %vm955_vm7, %v2302_v26, %v963_v32  ;;  %v3969_v34 = vld [vmem:[#allocation22_spill] sm:$0xff] }
 0x1d6   : > { %v1075_v25 = vmul.f32 %v2308_v19, %v3560_v0  ;;  %v1694_v33 = vadd.f32 %v1693_v27, %v1692_v48  ;;  %v2312_v46 = vpop.eup %2311  ;;  %v1039_v53 = vadd.f32 %v1031_v42, %v1017_v62  ;;  %vm1067_vm10 = vcmp.ge.f32.partialorder %v3425_v61, 0.0 }
 0x1d7   : > { %v1081_v55 = vsel %vm1065_vm9, %v2306_v54, %v1073_v35  ;;  %v1800_v57 = vmul.f32 1.442695, %v1664_v49  ;;  %v2077_v15 = vadd.f32 -4.8481164, %v1199_v18  ;;  %v3970_v5 = vsub.f32 %v3962_v63, %v3969_v34 }
 0x1d8   : > { %v1083_v24 = vsel %vm1067_vm10, %v2308_v19, %v1075_v25  ;;  %v3624_v52 = vsub.f32 %v969_v4, %v1081_v55  ;;  %v1819_v36 = vmul.f32 1.442695, %v1694_v33  ;;  %v2314_v17 = vpop.eup %2313  ;;  %vm1207_vm11 = vcmp.gt.f32.partialorder %v3520_v30, 1e-05 }
 0x1d9   : > { %v1205_v20 = vsub.f32 %v3970_v5, %v1197_v6  ;;  %v3630_v0 = vsub.f32 %v971_v16, %v1083_v24  ;;  %2331 = vpow2.f32 %v1800_v57  ;;  %v2316_v42 = vpop.eup %2315  ;;  %v927_v26 = vadd.f32 %v919_v3, %v905_v50 }
 0x1da   : > { %v1247_v11 = vsel %vm1207_vm11, %v1225_v8, %v2077_v15  ;;  %v1217_v62 = vmax.f32 %v3624_v52, 1e-12  ;;  %2333 = vpow2.f32 %v1819_v36  ;;  %v2318_v44 = vpop.eup %2317  ;;  %v3638_v31 = vadd.f32 %v1767_v12, %v3550_v9 }
 0x1db   : > { %v1795_v63 = vrot.slane %v3585_v14, 1  ;;  %v1095_v30 = vsub.f32 0.0, %v1039_v53  ;;  %v1219_v6 = vmax.f32 %v3630_v0, 1e-12  ;;  %v2320_v38 = vpop.eup %2319  ;;  %v3644_v39 = vadd.f32 %v3596_v23, %v3574_v56 }
 0x1dc   : > { %v1145_v3 = vmax.f32 %v3460_v21, 0.0  ;;  %v1165_v50 = vmul.f32 0.6931472, %v2318_v44  ;;  %2335 = vlog2.f32 %v1217_v62  ;;  %v2322_v43 = vpop.eup %2321  ;;  %v2083_v18 = vadd.f32 -4.8481164, %v1205_v20  ;;  %v3974_v62 = vld [vmem:[#allocation33_spill] sm:$0xff] }
 0x1dd   : > { %v1263_v9 = vsel %vm1255_vm5, %v1095_v30, %v1247_v11  ;;  %v1029_v12 = vmul.f32 0.6931472, %v2312_v46  ;;  %2337 = vlog2.f32 %v1219_v6  ;;  %v2324_v32 = vpop.eup %2323  ;;  %v1087_v7 = vsub.f32 %v3965_v29, %v927_v26  ;;  %v3971_v46 = vld [vmem:[#allocation27_spill] sm:$0xff]  ;;  %v3975_v6 = vld [vmem:[#allocation5_spill] sm:$0xff] }
 0x1de   : > { %v917_v48 = vmul.f32 0.6931472, %v2310_v1  ;;  %v921_v10 = vmax.f32 %v3967_v59, 0.0  ;;  %v1177_v47 = vadd.f32 %v1165_v50, %v1145_v3  ;;  %v923_v56 = vmax.f32 %v3968_v41, 0.0 }
 0x1df   : > { %v925_v23 = vmax.f32 %v3940_v2, 0.0  ;;  %v1147_v54 = vmax.f32 %v3450_v13, 0.0  ;;  %v1169_v8 = vmul.f32 0.6931472, %v2324_v32  ;;  %v3656_v49 = vsel %vm1271_vm8, %v1087_v7, %v1263_v9  ;;  %v3977_v7 = vld [vmem:[#allocation42_spill] sm:$0xff] }
 0x1e0   : > { %v913_v27 = vmul.f32 0.6931472, %v2314_v17  ;;  %v1033_v19 = vmax.f32 %v3416_v60, 0.0  ;;  %v1237_v4 = vmul.f32 0.6931472, %v2320_v38  ;;  %v2326_v29 = vpop.eup %2325  ;;  %v1045_v16 = vadd.f32 %v1037_v37, %v1029_v12  ;;  %v3972_v60 = vld [vmem:[#allocation19_spill] sm:$0xff] }
 0x1e1   : > { %v909_v35 = vmul.f32 0.6931472, %v2316_v42  ;;  %v1021_v1 = vmul.f32 0.6931472, %v2322_v43  ;;  %v1179_v25 = vadd.f32 %v1169_v8, %v1147_v54  ;;  %v2328_v33 = vpop.eup %2327  ;;  %vm1257_vm12 = vcmp.gt.f32.partialorder %v3971_v46, 0.999 }
 0x1e2   : > { %v933_v53 = vadd.f32 %v925_v23, %v917_v48  ;;  %v1035_v55 = vmax.f32 %v3425_v61, 0.0  ;;  %v1185_v58 = vsub.f32 %v3460_v21, %v3951_v40  ;;  %v1193_v57 = vmul.f32 2.0, %v1177_v47  ;;  %v2330_v15 = vpop.eup %2329  ;;  %v3976_v43 = vld [vmem:[#allocation6_spill] sm:$0xff] }
 0x1e3   : > { %vm1273_vm13 = vcmp.lt.f32.partialorder %v3971_v46, -0.999  ;;  %v1187_v24 = vsub.f32 %v3450_v13, %v3972_v60  ;;  %v1195_v36 = vmul.f32 2.0, %v1179_v25  ;;  %vm1213_vm15 = vcmp.gt.f32.partialorder %v3582_v28, 1e-05  ;;  %v3981_v60 = vld [vmem:[#allocation45_spill] sm:$0xff] }
 0x1e4   : > { %vm1261_vm1 = vcmp.gt.f32.partialorder %v3973_v22, 0.999  ;;  %v1407_v37 = vsel %vm551_vm0, %v2330_v15, 0.0  ;;  %v931_v17 = vadd.f32 %v923_v56, %v913_v27  ;;  %v1025_v34 = vmul.f32 0.6931472, %v2326_v29  ;;  %v3980_v15 = vld [vmem:[#allocation13_spill] sm:$0xff] }
 0x1e5   : > { %v1253_v61 = vsel %vm1213_vm15, %v1237_v4, %v2083_v18  ;;  %v1408_v5 = vadd.f32 %v2328_v33, %v1407_v37  ;;  %v929_v20 = vadd.f32 %v921_v10, %v909_v35  ;;  %v1041_v21 = vadd.f32 %v1033_v19, %v1021_v1 }
 0x1e6   : > { %v1101_v40 = vsub.f32 0.0, %v1045_v16  ;;  %v2332_v42 = vpop.eup %2331  ;;  %v1093_v26 = vsub.f32 %v3940_v2, %v933_v53  ;;  %v1201_v11 = vsub.f32 %v1185_v58, %v1193_v57  ;;  %vm1259_vm2 = vcmp.gt.f32.partialorder %v3974_v62, 0.999  ;;  %v3979_v16 = vld [vmem:[#allocation43_spill] sm:$0xff] }
 0x1e7   : > { %vm1277_vm5 = vcmp.lt.f32.partialorder %v3973_v22, -0.999  ;;  %v2334_v13 = vpop.eup %2333  ;;  %v1409_v28 = vrot.slane %v1408_v5, 4  ;;  %v1203_v44 = vsub.f32 %v1187_v24, %v1195_v36  ;;  %v1814_v38 = vmul.f32 %v2332_v42, %v3975_v6 }
 0x1e8   : > { %v1269_v30 = vsel %vm1261_vm1, %v1101_v40, %v1253_v61  ;;  %v1043_v3 = vadd.f32 %v1035_v55, %v1025_v34  ;;  %v1091_v50 = vsub.f32 %v3968_v41, %v931_v17  ;;  %vm1275_vm6 = vcmp.lt.f32.partialorder %v3974_v62, -0.999 }
 0x1e9   : > { %v1832_v2 = vmul.f32 %v2334_v13, %v3976_v43  ;;  %v2336_v18 = vpop.eup %2335  ;;  %v1410_v9 = vadd.f32 %v1409_v28, %v1408_v5  ;;  %v1089_v12 = vsub.f32 %v3967_v59, %v929_v20  ;;  %v1097_v32 = vsub.f32 0.0, %v1041_v21  ;;  %v3978_v59 = vld [vmem:[#allocation31_spill] sm:$0xff] }
 0x1ea   : > { %v1816_v48 = vadd.f32 %v1814_v38, %v3977_v7  ;;  %v2338_v10 = vpop.eup %2337  ;;  %vm1209_vm7 = vcmp.gt.f32.partialorder %v3624_v52, 1e-05  ;;  %v1229_v47 = vmul.f32 0.6931472, %v2336_v18  ;;  %v2079_v56 = vadd.f32 -4.8481164, %v1201_v11 }
 0x1eb   : > { %v1285_v23 = vsel %vm1277_vm5, %v1093_v26, %v1269_v30  ;;  %v1411_v41 = vrot.slane %v1410_v9, 2  ;;  %v1233_v54 = vmul.f32 0.6931472, %v2338_v10  ;;  %v2081_v8 = vadd.f32 -4.8481164, %v1203_v44 }
 0x1ec   : > { %v2089_v27 = vclamps-f32 %v1816_v48, 1.0  ;;  %v1099_v19 = vsub.f32 0.0, %v1043_v3  ;;  %vm1211_vm8 = vcmp.gt.f32.partialorder %v3630_v0, 1e-05  ;;  %v1249_v4 = vsel %vm1209_vm7, %v1229_v47, %v2079_v56 }
 0x1ed   : > { %v1834_v29 = vadd.f32 %v1832_v2, %v3978_v59  ;;  %v1412_v35 = vadd.f32 %v1411_v41, %v1410_v9  ;;  %v1251_v1 = vsel %vm1211_vm8, %v1233_v54, %v2081_v8  ;;  %v1265_v52 = vsel %vm1257_vm12, %v1097_v32, %v1249_v4 }
 0x1ee   : > { %v1858_v25 = vmul.f32 %v2089_v27, %v3979_v16  ;;  %v1267_v33 = vsel %vm1259_vm2, %v1099_v19, %v1251_v1  ;;  %v1281_v53 = vsel %vm1273_vm13, %v1089_v12, %v1265_v52  ;;  %v1369_v55 = vrot.slane %v1285_v23, 4 }
 0x1ef   : > { %v1866_v58 = vmul.f32 %v2089_v27, %v3638_v31  ;;  %v1413_v0 = vrot.slane %v1412_v35, 1  ;;  %v1283_v57 = vsel %vm1275_vm6, %v1091_v50, %v1267_v33  ;;  %v3982_v24 = vsub.f32 %v3980_v15, %v3981_v60  ;;  %v3983_v31 = vld [vmem:[#allocation12_spill] sm:$0xff] }
 0x1f0   : > { %v1352_v22 = vrot.slane %v1281_v53, 2  ;;  %v1353_v37 = vrot.slane %v1283_v57, 2  ;;  %v1368_v17 = vrot.slane %v1283_v57, 4  ;;  %v1860_v34 = vadd.f32 %v1858_v25, %v1834_v29 }
 0x1f1   : > { %v1343_v36 = vadd.f32 %v3982_v24, %v1281_v53  ;;  %v1868_v61 = vadd.f32 %v1866_v58, %v3644_v39  ;;  %v1796_v46 = vadd.f32 %v1795_v63, %v3585_v14  ;;  %v3984_v5 = vsub.f32 %v3983_v31, %v3981_v60 }
 0x1f2   : > { %v1414_v21 = vadd.f32 %v1413_v0, %v1412_v35  ;;  %v1354_v40 = vsel %vm1348_vm4, %v1352_v22, %v1353_v37  ;;  %v1370_v26 = vsel %vm737_vm3, %v1368_v17, %v1369_v55  ;;  %v2091_v11 = vclamps-f32 %v1860_v34, 1.0  ;;  %v3985_v22 = vld [vmem:[#allocation3_spill] sm:$0xff] }
 0x1f3   : > { %v1341_v20 = vadd.f32 %v3984_v5, %v3656_v49  ;;  %v1362_v42 = vadd.f32 %v1353_v37, %v1343_v36  ;;  %v1894_v49 = vadd.f32 1.0, %v3495_v51  ;;  %v2373_v0 = vmov 1966171168  }
 0x1f4   : > { %2339 = vlog2.f32 %v1414_v21  ;;  %v1870_v39 = vmul.f32 %v2091_v11, %v1796_v46  ;;  %v1880_v28 = vrot.slane %v2091_v11, 7  ;;  %v1433_v57 = vunpack.c.l.s4 %v2373_v0 }
 0x1f5   : > { %v1360_v62 = vadd.f32 %v1354_v40, %v1341_v20  ;;  %v1378_v13 = vadd.f32 %v1369_v55, %v1362_v42  ;;  %v1896_v43 = vmul.f32 0.5, %v1894_v49 }
 0x1f6   : > { %v1872_v63 = vadd.f32 %v1870_v39, %v1868_v61  ;;  %v1891_v30 = vsel %vm1889_vm14, %v2089_v27, %v1880_v28  ;;  %v1434_v15 = vunpack.c.0.s8 %v1433_v57  ;;  %v3986_v61 = vlaneseq }
 0x1f7   : > { %v1376_v44 = vadd.f32 %v1370_v26, %v1360_v62  ;;  %v1387_v14 = vsel %vm551_vm0, %v1378_v13, -inf  ;;  %v1898_v32 = vmax.f32 %v1896_v43, 0.0 }
 0x1f8   : > { %v2093_v38 = vclamps-f32 %v1872_v63, 1.0  ;;  %v1437_v37 = vsub.s32 %v1434_v15, %v3985_v22 }
 0x1f9   : > { %v1388_v6 = vmax.f32 %v1376_v44, %v1387_v14  ;;  %v1900_v41 = vmin.f32 %v1898_v32, 1.0 }
 0x1fa   : > { %v1886_v50 = vrot.slane %v2093_v38, 6 }
 0x1fb   : > { %v1389_v3 = vrot.slane %v1388_v6, 4 }
 0x1fc   : > { %v1893_v18 = vsel %vm551_vm0, %v1891_v30, %v1886_v50 }
 0x1fd   : > { %v1390_v2 = vmax.f32 %v1388_v6, %v1389_v3  ;;  %v1895_v12 = vadd.f32 1.0, %v1893_v18 }
 0x1ff   : > { %v1391_v9 = vrot.slane %v1390_v2, 2  ;;  %v1897_v48 = vmul.f32 0.5, %v1895_v12 }
 0x201   : > { %v1392_v7 = vmax.f32 %v1390_v2, %v1391_v9  ;;  %v2340_v10 = vpop.eup %2339  ;;  %v1899_v23 = vmax.f32 %v1897_v48, 0.0 }
 0x202   : > { %v1424_v47 = vmul.f32 0.6931472, %v2340_v10 }
 0x203   : > { %v1393_v56 = vrot.slane %v1392_v7, 1  ;;  %v1901_v8 = vmin.f32 %v1899_v23, 1.0 }
 0x204   : > { %v1427_v51 = vadd.f32 %v1424_v47, %v3607_v45 }
 0x205   : > { %v1394_v54 = vmax.f32 %v1392_v7, %v1393_v56  ;;  %v1904_v4 = vcombine.low %v1900_v41, %v1901_v8 }
 0x207   : > { %v1396_v27 = vsub.f32 %v1376_v44, %v1394_v54  ;;  %v1398_v19 = vsub.f32 %v1378_v13, %v1394_v54  ;;  %1906 = vst [vmem:[%s383_s23] sm:$0x77] %v1904_v4 }
 0x209   : > { %v1401_v59 = vmul.f32 1.442695, %v1396_v27  ;;  %v1405_v29 = vmul.f32 1.442695, %v1398_v19 }
 0x20b   : > { %2341 = vpow2.f32 %v1401_v59 }
 0x20c   : > { %2343 = vpow2.f32 %v1405_v29 }
 0x218   : > { %v2342_v35 = vpop.eup %2341 }
 0x219   : > { %v2344_v1 = vpop.eup %2343 }
 0x21a   : > { %v1415_v52 = vsel %vm551_vm0, %v2344_v1, 0.0  ;;  %vm1449_vm0 = vcmp.lt.s32.totalorder %v3986_v61, 256 }
 0x21b   : > { %v1416_v45 = vadd.f32 %v2342_v35, %v1415_v52 }
 0x21d   : > { %v1417_v16 = vrot.slane %v1416_v45, 4 }
 0x21f   : > { %v1418_v25 = vadd.f32 %v1417_v16, %v1416_v45 }
 0x221   : > { %v1419_v33 = vrot.slane %v1418_v25, 2 }
 0x223   : > { %v1420_v53 = vadd.f32 %v1419_v33, %v1418_v25 }
 0x225   : > { %v1421_v55 = vrot.slane %v1420_v53, 1 }
 0x227   : > { %v1422_v58 = vadd.f32 %v1421_v55, %v1420_v53 }
 0x229   : > { %2345 = vlog2.f32 %v1422_v58 }
 0x236   : > { %v2346_v60 = vpop.eup %2345 }
 0x237   : > { %v1426_v24 = vmul.f32 0.6931472, %v2346_v60 }
 0x239   : > { %v1428_v36 = vadd.f32 %v1426_v24, %v1394_v54 }
 0x23b   : > { %v1431_v17 = vcombine.low %v1427_v51, %v1428_v36 }
 0x23d   : > { %v1438_v34 = vrot.slane %v1431_v17, %v1437_v37 }
 0x23f   : > { %v1445_v46 = vrot.slane %v1438_v34, %v1437_v37 }
 0x241   : > { %1451 = vst.msk [vmem:[%s377_s27] sm:$0x3] %vm1449_vm0, %v1445_v46 }
 0x242 PF: > { %p15_p9 = scmp.ge.s32.totalorder %s2431_s28, 4   ;;  %s3987_s24 = smov %s2365_s25 }
 0x243   : > { %s3988_s25 = smov %s2440_s8  ;;  %s3989_s26 = smov %s2431_s28 }
 0x244   :  { %17 = sbr.rel (!%p15_p9) target bundleno = 2 (0x2), region = 123 }

</bundles_post_ra>
